<compile_context>
chip_gen: v7x
topology: tpu7x:2x2x1
jax: 0.10.0
libtpu: 0.0.40
codegen_flags: <defaults>
</compile_context>

<pallas_src>
import functools

import jax
import jax.numpy as jnp
from jax.experimental import pallas as pl
from jax.experimental.pallas import tpu as pltpu


# ----------------------------------------------------------------------------- helpers

def _round_up(x, m):
    return ((x + m - 1) // m) * m


def _vmem_budget():
    """(per-tile footprint budget, vmem_limit_bytes) from the actual chip's VMEM."""
    try:
        cap = int(pltpu.get_tpu_info().vmem_capacity_bytes)
    except Exception:
        cap = 64 * 1024 * 1024                               # conservative (v7x-sized)
    vmem_limit = min((cap * 3) // 4, 96 * 1024 * 1024)       # ~48 MiB v7x, 96 MiB v5e/v6e
    return vmem_limit // 2, vmem_limit


def _footprint_bytes(TH, TC, Wp, W, in_bytes, out_bytes):
    """Double-buffered in/out blocks + in-kernel f32 temporaries (xf, tmp, acc)."""
    Wa = min(_round_up(W, 8), Wp)
    blk_in = (TH + 2) * Wp * TC * in_bytes
    blk_out = TH * W * TC * out_bytes
    tmps = ((TH + 2) * Wp + TH * Wp + TH * Wa) * TC * 4
    return 2 * blk_in + 2 * blk_out + tmps


def _chan_tile_candidates(C):
    cands = [C]
    cands += sorted((c for c in range(128, C, 128) if C % c == 0), reverse=True)
    return cands


def _choose_tiles(B, H, W, C, in_bytes, out_bytes, budget, row_tile=None, chan_tile=None):
    Wp = _round_up(W + 2, 8)

    if chan_tile is not None:
        assert C % chan_tile == 0 and (chan_tile == C or chan_tile % 128 == 0), (C, chan_tile)
        cands = [chan_tile]
    else:
        cands = _chan_tile_candidates(C)

    TH, TC = min(row_tile, H) if row_tile is not None else H, cands[-1]
    for tc in cands:
        th = H if row_tile is None else min(row_tile, H)
        if row_tile is None:
            while th > 8 and _footprint_bytes(th, tc, Wp, W, in_bytes, out_bytes) > budget:
                th = max(8, (th + 1) // 2)
        TH, TC = th, tc
        if _footprint_bytes(th, tc, Wp, W, in_bytes, out_bytes) <= budget:
            break

    # v7x has 2 TensorCores: make sure the grid has >= 2 steps to shard across them.
    n_h = -(-H // TH)
    n_c = C // TC
    if row_tile is None and B * n_h * n_c == 1 and H >= 2:
        TH = (H + 1) // 2
    return TH, TC


# ----------------------------------------------------------------------------- kernel

def _dwconv_kernel(x_ref, w_ref, b_ref, o_ref):
    """Depthwise 3x3, stride 1.

    x_ref: (1, TH+2, Wp, TC)  padded input window (halo rows included, NHWC)
    w_ref: (9, TC)            tap-major depthwise weights (row = ky*3 + kx)
    b_ref: (1, TC)            bias
    o_ref: (1, TH, W, TC)     output tile
    """
    TH = o_ref.shape[1]
    W = o_ref.shape[2]
    Wp = x_ref.shape[2]
    TC = x_ref.shape[3]
    Wa = min(_round_up(W, 8), Wp)            # 8-aligned accumulation width (<= Wp)

    w = w_ref[...].astype(jnp.float32)       # (9, TC); resident across inner grid steps
    xf = x_ref[0].astype(jnp.float32)        # (TH+2, Wp, TC); single upcast

    acc = None
    for kx in range(3):
        # Sum the three ky taps at the un-shifted padded width (H slabs are outer-dim
        # slices -> no relayout) ...
        tmp = xf[0:TH] * w[kx].reshape(1, 1, TC)
        tmp = tmp + xf[1:TH + 1] * w[3 + kx].reshape(1, 1, TC)
        tmp = tmp + xf[2:TH + 2] * w[6 + kx].reshape(1, 1, TC)
        # ... then one sublane rotation per kx (XLU slot); wrap-around columns land
        # at >= W and are discarded by the final prefix slice.
        if kx:
            tmp = pltpu.roll(tmp, shift=Wp - kx, axis=1)
        tmp = tmp[:, :Wa, :]
        acc = tmp if acc is None else acc + tmp

    out = acc[:, :W, :] + b_ref[0].astype(jnp.float32).reshape(1, 1, TC)
    o_ref[0] = out.astype(o_ref.dtype)       # single fused store, bias in the epilogue


# ----------------------------------------------------------------------------- wrapper

def dwconv_pallas(x_bnc, H, W, w9c, bias, *, row_tile=None, chan_tile=None):
    """x: (B, N, C), w9c: (9, C) (row = ky*3 + kx), bias: (C,) -> (B, N, C)."""
    B, N, C = x_bnc.shape
    assert N == H * W, (N, H, W)
    dtype = x_bnc.dtype
    itemsize = jnp.dtype(dtype).itemsize

    budget, vmem_limit = _vmem_budget()
    TH, TC = _choose_tiles(B, H, W, C, itemsize, itemsize, budget,
                           row_tile=row_tile, chan_tile=chan_tile)
    n_h = -(-H // TH)
    n_c = C // TC
    Hpad = n_h * TH
    Wp = _round_up(W + 2, 8)
    assert Wp >= W + 2                                   # roll wrap stays out of [0, W)

    # Single pad: 3x3 conv halo (1 each side), bottom rows so every (possibly ragged)
    # TH+2-row window stays in bounds, and W rounded up to a sublane multiple.
    x = x_bnc.reshape(B, H, W, C)
    xp = jnp.pad(x, ((0, 0), (1, 1 + Hpad - H), (1, Wp - W - 1), (0, 0)))

    if n_h == 1:
        x_spec = pl.BlockSpec((1, TH + 2, Wp, TC), lambda c, b, t: (b, 0, 0, c))
    else:
        # Overlapping halo windows expressed in the pipeline: element-offset indexing
        # on the H axis (no wrapper-side gathered copy of overlapping row tiles).
        x_spec = pl.BlockSpec((1, pl.Element(TH + 2), Wp, TC),
                              lambda c, b, t: (b, t * TH, 0, c))

    out = pl.pallas_call(
        _dwconv_kernel,
        out_shape=jax.ShapeDtypeStruct((B, H, W, C), dtype),
        grid=(n_c, B, n_h),                      # channels outermost -> weights resident
        in_specs=[
            x_spec,
            pl.BlockSpec((9, TC), lambda c, b, t: (0, c)),
            pl.BlockSpec((1, TC), lambda c, b, t: (0, c)),
        ],
        out_specs=pl.BlockSpec((1, TH, W, TC), lambda c, b, t: (b, t, 0, c)),
        compiler_params=pltpu.CompilerParams(
            dimension_semantics=("parallel", "parallel", "parallel"),
            vmem_limit_bytes=vmem_limit,
        ),
    )(xp, w9c, bias.reshape(1, C))

    return out.reshape(B, N, C)


def dwconv_forward(x_bnc, H, W, weight_oihw, bias, *, row_tile=None, chan_tile=None):
    """Matches DWConv.forward(x, H, W).  weight in torch layout (C, 1, 3, 3)."""
    C = weight_oihw.shape[0]
    w9c = jnp.transpose(weight_oihw, (2, 3, 1, 0)).reshape(9, C)   # row = ky*3 + kx
    return dwconv_pallas(x_bnc, H, W, w9c, bias,
                         row_tile=row_tile, chan_tile=chan_tile)


class DWConv:
    """Pallas-backed equivalent of the PyTorch DWConv module ((B, N, C) -> (B, N, C))."""

    def __init__(self, dim=768, *, key=None):
        key = jax.random.PRNGKey(0) if key is None else key
        kw, kb = jax.random.split(key)
        bound = 1.0 / 3.0   # kaiming_uniform(a=sqrt(5)) / bias bound for fan_in = 1*3*3
        self.weight = jax.random.uniform(kw, (dim, 1, 3, 3), jnp.float32, -bound, bound)
        self.bias = jax.random.uniform(kb, (dim,), jnp.float32, -bound, bound)
        self.dim = dim

    def __call__(self, x, H, W):
        return dwconv_forward(x, H, W, self.weight, self.bias)


# ----------------------------------------------------------------------------- reference

def dwconv_reference(x_bnc, H, W, weight_oihw, bias):
    """Pure-JAX reference: grouped conv via lax.conv_general_dilated (f32)."""
    B, N, C = x_bnc.shape
    x = x_bnc.reshape(B, H, W, C).astype(jnp.float32)
    w_hwio = jnp.transpose(weight_oihw, (2, 3, 1, 0)).astype(jnp.float32)   # (3, 3, 1, C)
    y = jax.lax.conv_general_dilated(
        x, w_hwio, window_strides=(1, 1), padding=((1, 1), (1, 1)),
        dimension_numbers=("NHWC", "HWIO", "NHWC"), feature_group_count=C)
    y = y + bias.astype(jnp.float32).reshape(1, 1, 1, C)
    return y.reshape(B, N, C)


# ----------------------------------------------------------------------------- main

if __name__ == "__main__":
    root = jax.random.PRNGKey(0)

    # Case 1: module-style usage (f32, single row/channel tile, blocked indexing).
    B, C, H, W = 2, 32, 16, 16
    k_x, k_m = jax.random.split(jax.random.fold_in(root, 0))
    dw = DWConv(dim=C, key=k_m)
    x = jax.random.normal(k_x, (B, H * W, C), jnp.float32)
    y = jax.block_until_ready(jax.jit(lambda a: dw(a, H, W))(x))
    y_ref = dwconv_reference(x, H, W, dw.weight, dw.bias)
    assert y.shape == (B, H * W, C), y.shape
    assert bool(jnp.all(jnp.isfinite(y)))
    assert float(jnp.max(jnp.abs(y - y_ref))) < 1e-3

    # Case 2: ragged H + row tiling (halo via element-offset indexing, ragged output
    #         tile masked by Pallas), W not a multiple of 8.
    # Case 3: channel-tiled grid axis (TC = 128), weights resident across inner steps.
    # Case 4: bf16 I/O (f32 accumulation in-kernel) + row tiling + ragged H.
    cases = [
        (2, 64, 10, 12, 8, None, jnp.float32, 1e-3),
        (1, 256, 8, 8, None, 128, jnp.float32, 1e-3),
        (2, 128, 12, 16, 8, None, jnp.bfloat16, 4e-2),
    ]
    for i, (B, C, H, W, rt, ct, dt, tol) in enumerate(cases, start=1):
        kk = jax.random.fold_in(root, i)
        k_x, k_w, k_b = jax.random.split(kk, 3)
        x = jax.random.normal(k_x, (B, H * W, C), jnp.float32)
        wgt = 0.2 * jax.random.normal(k_w, (C, 1, 3, 3), jnp.float32)
        bia = 0.2 * jax.random.normal(k_b, (C,), jnp.float32)
        fwd = jax.jit(functools.partial(dwconv_forward, row_tile=rt, chan_tile=ct),
                      static_argnums=(1, 2))
        y = jax.block_until_ready(fwd(x.astype(dt), H, W, wgt.astype(dt), bia.astype(dt)))
        y_ref = dwconv_reference(x.astype(dt), H, W, wgt.astype(dt), bia.astype(dt))
        assert y.shape == (B, H * W, C), y.shape
        assert y.dtype == jnp.dtype(dt), y.dtype
        yf = y.astype(jnp.float32)
        assert bool(jnp.all(jnp.isfinite(yf)))
        assert float(jnp.max(jnp.abs(yf - y_ref))) < tol

    print("KERNEL_OK")
</pallas_src>

<mosaic_0001>
module attributes {stable_mosaic.version = 11 : i64} {
  func.func @_dwconv_kernel(%arg0: i32, %arg1: i32, %arg2: i32, %arg3: memref<1x18x24x32xf32, #tpu.memory_space<vmem>>, %arg4: memref<9x32xf32, #tpu.memory_space<vmem>>, %arg5: memref<1x32xf32, #tpu.memory_space<vmem>>, %arg6: memref<1x16x16x32xf32, #tpu.memory_space<vmem>>) attributes {dimension_semantics = [#tpu.dimension_semantics<parallel>, #tpu.dimension_semantics<parallel>, #tpu.dimension_semantics<parallel>], iteration_bounds = array<i64: 1, 2, 1>, scalar_prefetch = 0 : i64, scratch_operands = 0 : i64, tpu.core_type = #tpu.core_type<tc>, window_params = [{transform_indices = @transform_0, window_bounds = array<i64: 1, 18, 24, 32>}, {transform_indices = @transform_1, window_bounds = array<i64: 9, 32>}, {transform_indices = @transform_2, window_bounds = array<i64: 1, 32>}, {transform_indices = @transform_3, window_bounds = array<i64: 1, 16, 16, 32>}]} {
    %c0 = arith.constant 0 : index
    %c0_0 = arith.constant 0 : index
    %0 = vector.load %arg4[%c0, %c0_0] : memref<9x32xf32, #tpu.memory_space<vmem>>, vector<9x32xf32>
    %c0_1 = arith.constant 0 : index
    %c0_2 = arith.constant 0 : index
    %c0_3 = arith.constant 0 : index
    %c0_4 = arith.constant 0 : index
    %1 = vector.load %arg3[%c0_1, %c0_2, %c0_3, %c0_4] : memref<1x18x24x32xf32, #tpu.memory_space<vmem>>, vector<1x18x24x32xf32>
    %2 = vector.shape_cast %1 : vector<1x18x24x32xf32> to vector<18x24x32xf32>
    %3 = vector.extract_strided_slice %2 {offsets = [0, 0, 0], sizes = [16, 24, 32], strides = [1, 1, 1]} : vector<18x24x32xf32> to vector<16x24x32xf32>
    %4 = vector.extract_strided_slice %0 {offsets = [0, 0], sizes = [1, 32], strides = [1, 1]} : vector<9x32xf32> to vector<1x32xf32>
    %5 = vector.shape_cast %4 : vector<1x32xf32> to vector<32xf32>
    %6 = vector.shape_cast %5 : vector<32xf32> to vector<1x1x32xf32>
    %7 = vector.broadcast %6 : vector<1x1x32xf32> to vector<16x24x32xf32>
    %8 = arith.mulf %3, %7 : vector<16x24x32xf32>
    %9 = vector.extract_strided_slice %2 {offsets = [1, 0, 0], sizes = [16, 24, 32], strides = [1, 1, 1]} : vector<18x24x32xf32> to vector<16x24x32xf32>
    %10 = vector.extract_strided_slice %0 {offsets = [3, 0], sizes = [1, 32], strides = [1, 1]} : vector<9x32xf32> to vector<1x32xf32>
    %11 = vector.shape_cast %10 : vector<1x32xf32> to vector<32xf32>
    %12 = vector.shape_cast %11 : vector<32xf32> to vector<1x1x32xf32>
    %13 = vector.broadcast %12 : vector<1x1x32xf32> to vector<16x24x32xf32>
    %14 = arith.mulf %9, %13 : vector<16x24x32xf32>
    %15 = arith.addf %8, %14 : vector<16x24x32xf32>
    %16 = vector.extract_strided_slice %2 {offsets = [2, 0, 0], sizes = [16, 24, 32], strides = [1, 1, 1]} : vector<18x24x32xf32> to vector<16x24x32xf32>
    %17 = vector.extract_strided_slice %0 {offsets = [6, 0], sizes = [1, 32], strides = [1, 1]} : vector<9x32xf32> to vector<1x32xf32>
    %18 = vector.shape_cast %17 : vector<1x32xf32> to vector<32xf32>
    %19 = vector.shape_cast %18 : vector<32xf32> to vector<1x1x32xf32>
    %20 = vector.broadcast %19 : vector<1x1x32xf32> to vector<16x24x32xf32>
    %21 = arith.mulf %16, %20 : vector<16x24x32xf32>
    %22 = arith.addf %15, %21 : vector<16x24x32xf32>
    %23 = vector.extract_strided_slice %22 {offsets = [0, 0, 0], sizes = [16, 16, 32], strides = [1, 1, 1]} : vector<16x24x32xf32> to vector<16x16x32xf32>
    %24 = vector.extract_strided_slice %2 {offsets = [0, 0, 0], sizes = [16, 24, 32], strides = [1, 1, 1]} : vector<18x24x32xf32> to vector<16x24x32xf32>
    %25 = vector.extract_strided_slice %0 {offsets = [1, 0], sizes = [1, 32], strides = [1, 1]} : vector<9x32xf32> to vector<1x32xf32>
    %26 = vector.shape_cast %25 : vector<1x32xf32> to vector<32xf32>
    %27 = vector.shape_cast %26 : vector<32xf32> to vector<1x1x32xf32>
    %28 = vector.broadcast %27 : vector<1x1x32xf32> to vector<16x24x32xf32>
    %29 = arith.mulf %24, %28 : vector<16x24x32xf32>
    %30 = vector.extract_strided_slice %2 {offsets = [1, 0, 0], sizes = [16, 24, 32], strides = [1, 1, 1]} : vector<18x24x32xf32> to vector<16x24x32xf32>
    %31 = vector.extract_strided_slice %0 {offsets = [4, 0], sizes = [1, 32], strides = [1, 1]} : vector<9x32xf32> to vector<1x32xf32>
    %32 = vector.shape_cast %31 : vector<1x32xf32> to vector<32xf32>
    %33 = vector.shape_cast %32 : vector<32xf32> to vector<1x1x32xf32>
    %34 = vector.broadcast %33 : vector<1x1x32xf32> to vector<16x24x32xf32>
    %35 = arith.mulf %30, %34 : vector<16x24x32xf32>
    %36 = arith.addf %29, %35 : vector<16x24x32xf32>
    %37 = vector.extract_strided_slice %2 {offsets = [2, 0, 0], sizes = [16, 24, 32], strides = [1, 1, 1]} : vector<18x24x32xf32> to vector<16x24x32xf32>
    %38 = vector.extract_strided_slice %0 {offsets = [7, 0], sizes = [1, 32], strides = [1, 1]} : vector<9x32xf32> to vector<1x32xf32>
    %39 = vector.shape_cast %38 : vector<1x32xf32> to vector<32xf32>
    %40 = vector.shape_cast %39 : vector<32xf32> to vector<1x1x32xf32>
    %41 = vector.broadcast %40 : vector<1x1x32xf32> to vector<16x24x32xf32>
    %42 = arith.mulf %37, %41 : vector<16x24x32xf32>
    %43 = arith.addf %36, %42 : vector<16x24x32xf32>
    %c23_i32 = arith.constant 23 : i32
    %44 = tpu.dynamic_rotate %43 by %c23_i32 dim 1 : vector<16x24x32xf32>, i32 -> vector<16x24x32xf32>
    %45 = vector.extract_strided_slice %44 {offsets = [0, 0, 0], sizes = [16, 16, 32], strides = [1, 1, 1]} : vector<16x24x32xf32> to vector<16x16x32xf32>
    %46 = arith.addf %23, %45 : vector<16x16x32xf32>
    %47 = vector.extract_strided_slice %2 {offsets = [0, 0, 0], sizes = [16, 24, 32], strides = [1, 1, 1]} : vector<18x24x32xf32> to vector<16x24x32xf32>
    %48 = vector.extract_strided_slice %0 {offsets = [2, 0], sizes = [1, 32], strides = [1, 1]} : vector<9x32xf32> to vector<1x32xf32>
    %49 = vector.shape_cast %48 : vector<1x32xf32> to vector<32xf32>
    %50 = vector.shape_cast %49 : vector<32xf32> to vector<1x1x32xf32>
    %51 = vector.broadcast %50 : vector<1x1x32xf32> to vector<16x24x32xf32>
    %52 = arith.mulf %47, %51 : vector<16x24x32xf32>
    %53 = vector.extract_strided_slice %2 {offsets = [1, 0, 0], sizes = [16, 24, 32], strides = [1, 1, 1]} : vector<18x24x32xf32> to vector<16x24x32xf32>
    %54 = vector.extract_strided_slice %0 {offsets = [5, 0], sizes = [1, 32], strides = [1, 1]} : vector<9x32xf32> to vector<1x32xf32>
    %55 = vector.shape_cast %54 : vector<1x32xf32> to vector<32xf32>
    %56 = vector.shape_cast %55 : vector<32xf32> to vector<1x1x32xf32>
    %57 = vector.broadcast %56 : vector<1x1x32xf32> to vector<16x24x32xf32>
    %58 = arith.mulf %53, %57 : vector<16x24x32xf32>
    %59 = arith.addf %52, %58 : vector<16x24x32xf32>
    %60 = vector.extract_strided_slice %2 {offsets = [2, 0, 0], sizes = [16, 24, 32], strides = [1, 1, 1]} : vector<18x24x32xf32> to vector<16x24x32xf32>
    %61 = vector.extract_strided_slice %0 {offsets = [8, 0], sizes = [1, 32], strides = [1, 1]} : vector<9x32xf32> to vector<1x32xf32>
    %62 = vector.shape_cast %61 : vector<1x32xf32> to vector<32xf32>
    %63 = vector.shape_cast %62 : vector<32xf32> to vector<1x1x32xf32>
    %64 = vector.broadcast %63 : vector<1x1x32xf32> to vector<16x24x32xf32>
    %65 = arith.mulf %60, %64 : vector<16x24x32xf32>
    %66 = arith.addf %59, %65 : vector<16x24x32xf32>
    %c22_i32 = arith.constant 22 : i32
    %67 = tpu.dynamic_rotate %66 by %c22_i32 dim 1 : vector<16x24x32xf32>, i32 -> vector<16x24x32xf32>
    %68 = vector.extract_strided_slice %67 {offsets = [0, 0, 0], sizes = [16, 16, 32], strides = [1, 1, 1]} : vector<16x24x32xf32> to vector<16x16x32xf32>
    %69 = arith.addf %46, %68 : vector<16x16x32xf32>
    %c0_5 = arith.constant 0 : index
    %c0_6 = arith.constant 0 : index
    %70 = vector.load %arg5[%c0_5, %c0_6] : memref<1x32xf32, #tpu.memory_space<vmem>>, vector<1x32xf32>
    %71 = vector.shape_cast %70 : vector<1x32xf32> to vector<32xf32>
    %72 = vector.shape_cast %71 : vector<32xf32> to vector<1x1x32xf32>
    %73 = vector.broadcast %72 : vector<1x1x32xf32> to vector<16x16x32xf32>
    %74 = arith.addf %69, %73 : vector<16x16x32xf32>
    %c0_7 = arith.constant 0 : index
    %c0_8 = arith.constant 0 : index
    %c0_9 = arith.constant 0 : index
    %c0_10 = arith.constant 0 : index
    %75 = vector.load %arg6[%c0_7, %c0_8, %c0_9, %c0_10] : memref<1x16x16x32xf32, #tpu.memory_space<vmem>>, vector<1x16x16x32xf32>
    %76 = vector.shape_cast %75 : vector<1x16x16x32xf32> to vector<16x16x32xf32>
    %77 = vector.shape_cast %74 : vector<16x16x32xf32> to vector<1x16x16x32xf32>
    tpu.vector_store %arg6[%c0_7, %c0_8, %c0_9, %c0_10], %77 {strides = array<i32>} : memref<1x16x16x32xf32, #tpu.memory_space<vmem>>, vector<1x16x16x32xf32>,
    return
  }
  func.func @transform_0(%arg0: i32, %arg1: i32, %arg2: i32) -> (i32, i32, i32, i32) {
    %c0_i32 = arith.constant 0 : i32
    %c0_i32_0 = arith.constant 0 : i32
    %c0_i32_1 = arith.constant 0 : i32
    return %arg1, %c0_i32, %c0_i32_0, %arg0 : i32, i32, i32, i32
  }
  func.func @transform_1(%arg0: i32, %arg1: i32, %arg2: i32) -> (i32, i32) {
    %c0_i32 = arith.constant 0 : i32
    %c0_i32_0 = arith.constant 0 : i32
    return %c0_i32, %arg0 : i32, i32
  }
  func.func @transform_2(%arg0: i32, %arg1: i32, %arg2: i32) -> (i32, i32) {
    %c0_i32 = arith.constant 0 : i32
    %c0_i32_0 = arith.constant 0 : i32
    return %c0_i32, %arg0 : i32, i32
  }
  func.func @transform_3(%arg0: i32, %arg1: i32, %arg2: i32) -> (i32, i32, i32, i32) {
    %c0_i32 = arith.constant 0 : i32
    %c0_i32_0 = arith.constant 0 : i32
    return %arg1, %arg2, %c0_i32, %arg0 : i32, i32, i32, i32
  }
}

</mosaic_0001>

<bundles_post_ra>
// kernel: _lambda_.1
= control target key start
LH: loop header
LB: loop body
LE: loop exit
PB: predicated region body
PF: predicated region fallthrough
CT: control target
= control target key end

     0   :  { %s1504_s12 = smov 0   ;;  %s1506_s13 = smov 0   ;;  %s2722_s0 = inlined_call_operand.vmem [shape: f32[2,18,24,32], index: 0, kind: input, shape index: {}]   ;;  %s2723_s1 = inlined_call_operand.vmem [shape: f32[9,32], index: 1, kind: input, shape index: {}]   ;;  %s2724_s2 = inlined_call_operand.vmem [shape: f32[1,32], index: 2, kind: input, shape index: {}]   ;;  %s2725_s3 = inlined_call_operand.vmem [shape: f32[2,16,16,32], index: 3, kind: output, shape index: {}]  }
   0x1   :  { %s1508_s14 = smov 0  }
   0x2 LB: > { %s28_s15 = sadd.s32 1, %s1478_s13  ;;  %p1424_p0 = scmp.ge.s32.totalorder %s1482_s14, 1  ;;  %s1482_s14 = sphi %s1508_s14, %s13_s14   ;;  %s1478_s13 = sphi %s1506_s13, %s2727_s13   ;;  %s1474_s12 = sphi %s1504_s12, %s2726_s12  }
   0x3   : > { %p30_p1 = scmp.ge.s32.totalorder %s28_s15, 2  ;;  %p182_p2 = scmp.lt.s32.totalorder %s1482_s14, 3 }
   0x5   : > { %s2729_s15 = smov (%p30_p1, %s28_s15), 0  ;;  %p183_p3 = pnand %p1424_p0, %p182_p2 }
   0x6   : > { %p224_p4 = scmp.lt.s32.totalorder (!%p183_p3), %s1474_s12, 1  ;;  %v309_v0 = vlaneseq (!%p183_p3)  ;;  %v253_v2 = vld [vmem:[%s2723_s1] sm:$0xff] (!%p183_p3)  ;;  %v1566_v21 = vld [vmem:[%s2723_s1 + $0x8] ss:$0 sm:$0xff] (!%p183_p3)  ;;  %vm1252_vm2 = vcmask (!%p183_p3), 261120  }
   0x7   : > { %186 = sbr.rel (%p183_p3) target bundleno = 252 (0xfc), region = 32 }
   0x8   : > { %v1524_v1 = vshrl.u32 (!%p183_p3), %v309_v0, 7 }
   0xa   : > { %v311_v3 = vsub.s32 (!%p183_p3), 0, %v1524_v1  ;;  %v347_v4 = vsub.s32 (!%p183_p3), 3, %v1524_v1  ;;  %v415_v5 = vsub.s32 (!%p183_p3), 6, %v1524_v1  ;;  %v483_v6 = vsub.s32 (!%p183_p3), 1, %v1524_v1 }
   0xb   : > { %v535_v7 = vsub.s32 (!%p183_p3), 4, %v1524_v1  ;;  %v635_v8 = vsub.s32 (!%p183_p3), 7, %v1524_v1  ;;  %v850_v9 = vsub.s32 (!%p183_p3), 2, %v1524_v1  ;;  %vm783_vm0 = vcmp.lt.s32.totalorder (!%p183_p3), %v1524_v1, 7 }
   0xc   : > { %v1542_v10 = vrot.slane (!%p183_p3), %v253_v2, %v311_v3  ;;  %v1544_v11 = vrot.slane (!%p183_p3), %v253_v2, %v347_v4  ;;  %v1546_v12 = vrot.slane (!%p183_p3), %v253_v2, %v415_v5  ;;  %v1548_v13 = vrot.slane (!%p183_p3), %v253_v2, %v483_v6 }
   0xd   : > { %v1556_v17 = vrot.slane (!%p183_p3), %v253_v2, %v535_v7  ;;  %v1558_v18 = vrot.slane (!%p183_p3), %v253_v2, %v635_v8  ;;  %v1560_v19 = vrot.slane (!%p183_p3), %v253_v2, %v850_v9  ;;  %v902_v20 = vsub.s32 (!%p183_p3), 5, %v1524_v1 }
   0xe   : > { %s2731_s12 = smov (!%p224_p4, %s1474_s12), 1  ;;  %vm1148_vm1 = vcmp.lt.s32.totalorder %v1524_v1, 6 }
   0xf   : > { %s1433_s18 = smul.u32 432, %s2731_s12  ;;  %v1594_v39 = vrot.slane %v253_v2, %v902_v20  ;;  %s1432_s24 = sshll.u32 %s2731_s12, 8 }
  0x10   : > { %s1659_s29 = scalar_lea.vmem %s2725_s3, %s1432_s24 }
  0x11   : > { %s1540_s21 = scalar_lea.vmem %s2722_s0, %s1433_s18 }
  0x12   : > { %v255_v14 = vld [vmem:[%s1540_s21] sm:$0xff]  ;;  %v256_v15 = vld [vmem:[%s1540_s21 + $0x8] sm:$0xff]  ;;  %v1554_v16 = vld [vmem:[%s1540_s21 + $0x18] sm:$0xff] }
  0x13   : > { %v1569_v22 = vld [vmem:[%s1540_s21 + $0x20] sm:$0xff]  ;;  %v1572_v23 = vld [vmem:[%s1540_s21 + $0x30] sm:$0xff]  ;;  %v313_v24 = vmul.f32 %v1542_v10, %v255_v14  ;;  %v349_v25 = vmul.f32 %v1544_v11, %v1554_v16  ;;  %v485_v26 = vmul.f32 %v1548_v13, %v255_v14  ;;  %v486_v27 = vmul.f32 %v1548_v13, %v256_v15  ;;  %v1580_v28 = vld [vmem:[%s1540_s21 + $0x38] sm:$0xff] }
  0x14   : > { %v417_v29 = vmul.f32 %v1546_v12, %v1572_v23  ;;  %v537_v30 = vmul.f32 %v1556_v17, %v1554_v16  ;;  %v538_v31 = vmul.f32 %v1556_v17, %v1569_v22  ;;  %v637_v32 = vmul.f32 %v1558_v18, %v1572_v23  ;;  %v257_v41 = vld [vmem:[%s1540_s21 + $0x10] sm:$0xff]  ;;  %v1600_v42 = vld [vmem:[%s1540_s21 + $0x28] sm:$0xff]  ;;  %v1618_v58 = vld [vmem:[%s1540_s21 + $0x40] sm:$0xff] }
  0x15   : > { %v381_v33 = vadd.f32 %v349_v25, %v313_v24  ;;  %v638_v34 = vmul.f32 %v1558_v18, %v1580_v28  ;;  %v852_v35 = vmul.f32 %v1560_v19, %v255_v14  ;;  %v853_v36 = vmul.f32 %v1560_v19, %v256_v15 }
  0x16   : > { %v585_v37 = vadd.f32 %v537_v30, %v485_v26  ;;  %v586_v38 = vadd.f32 %v538_v31, %v486_v27  ;;  %v1004_v40 = vmul.f32 %v1566_v21, %v1572_v23  ;;  %v1005_v44 = vmul.f32 %v1566_v21, %v1580_v28  ;;  %v1646_v30 = vld [vmem:[%s2724_s2] ss:$0 sm:$0xff] }
  0x17   : > { %v449_v43 = vadd.f32 %v417_v29, %v381_v33  ;;  %v314_v45 = vmul.f32 %v1542_v10, %v256_v15  ;;  %v904_v48 = vmul.f32 %v1594_v39, %v1554_v16  ;;  %v905_v49 = vmul.f32 %v1594_v39, %v1569_v22  ;;  %v1630_v15 = vld [vmem:[%s1540_s21 + $0x48] sm:$0xff] }
  0x18   : > { %v685_v46 = vadd.f32 %v637_v32, %v585_v37  ;;  %v686_v47 = vadd.f32 %v638_v34, %v586_v38  ;;  %v350_v50 = vmul.f32 %v1544_v11, %v1569_v22  ;;  %v418_v51 = vmul.f32 %v1546_v12, %v1580_v28 }
  0x19   : > { %v487_v52 = vmul.f32 %v1548_v13, %v257_v41  ;;  %v539_v53 = vmul.f32 %v1556_v17, %v1600_v42  ;;  %v952_v56 = vadd.f32 %v904_v48, %v852_v35  ;;  %v953_v57 = vadd.f32 %v905_v49, %v853_v36 }
  0x1a   : > { %v733_v54 = vrot.slane %v685_v46, 1  ;;  %v749_v55 = vrot.slane %v686_v47, 1  ;;  %v382_v59 = vadd.f32 %v350_v50, %v314_v45  ;;  %v639_v61 = vmul.f32 %v1558_v18, %v1618_v58 }
  0x1b   : > { %v587_v60 = vadd.f32 %v539_v53, %v487_v52  ;;  %v854_v62 = vmul.f32 %v1560_v19, %v257_v41  ;;  %v1052_v0 = vadd.f32 %v1004_v40, %v952_v56  ;;  %v1053_v2 = vadd.f32 %v1005_v44, %v953_v57  ;;  %v1662_v41 = vld [vmem:[%s1540_s21 + $0x50] sm:$0xff] }
  0x1c   : > { %v800_v63 = vsel %vm783_vm0, %v733_v54, %v749_v55  ;;  %v906_v3 = vmul.f32 %v1594_v39, %v1600_v42  ;;  %v450_v5 = vadd.f32 %v418_v51, %v382_v59  ;;  %v1006_v7 = vmul.f32 %v1566_v21, %v1618_v58 }
  0x1d   : > { %v816_v4 = vadd.f32 %v800_v63, %v449_v43  ;;  %v687_v6 = vadd.f32 %v639_v61, %v587_v60  ;;  %v1100_v8 = vrot.slane %v1052_v0, 2  ;;  %v1116_v9 = vrot.slane %v1053_v2, 2  ;;  %v1689_v2 = vld [vmem:[%s1540_s21 + $0x58] sm:$0xff] }
  0x1e   : > { %v954_v14 = vadd.f32 %v906_v3, %v854_v62  ;;  %v315_v20 = vmul.f32 %v1542_v10, %v1554_v16  ;;  %v351_v25 = vmul.f32 %v1544_v11, %v1572_v23  ;;  %v419_v26 = vmul.f32 %v1546_v12, %v1630_v15 }
  0x1f   : > { %v765_v24 = vrot.slane %v687_v6, 1  ;;  %v488_v27 = vmul.f32 %v1548_v13, %v1554_v16  ;;  %v1165_v29 = vsel %vm1148_vm1, %v1100_v8, %v1116_v9  ;;  %v489_v32 = vmul.f32 %v1548_v13, %v1569_v22 }
  0x20   : > { %v1054_v31 = vadd.f32 %v1006_v7, %v954_v14  ;;  %v540_v33 = vmul.f32 %v1556_v17, %v1572_v23  ;;  %v1181_v34 = vadd.f32 %v1165_v29, %v816_v4  ;;  %v383_v36 = vadd.f32 %v351_v25, %v315_v20 }
  0x21   : > { %v784_v35 = vsel %vm783_vm0, %v749_v55, %v765_v24  ;;  %v541_v37 = vmul.f32 %v1556_v17, %v1580_v28  ;;  %v640_v44 = vmul.f32 %v1558_v18, %v1630_v15  ;;  %v641_v48 = vmul.f32 %v1558_v18, %v1662_v41 }
  0x22   : > { %v817_v38 = vadd.f32 %v784_v35, %v450_v5  ;;  %v1132_v40 = vrot.slane %v1054_v31, 2  ;;  %v588_v43 = vadd.f32 %v540_v33, %v488_v27  ;;  %v1220_v45 = vadd.f32 %v1646_v30, %v1181_v34  ;;  %v1712_v34 = vld [vmem:[%s1540_s21 + $0x60] sm:$0xff] }
  0x23   : > { %v451_v46 = vadd.f32 %v419_v26, %v383_v36  ;;  %v589_v47 = vadd.f32 %v541_v37, %v489_v32  ;;  %v855_v51 = vmul.f32 %v1560_v19, %v1554_v16  ;;  %v856_v52 = vmul.f32 %v1560_v19, %v1569_v22 }
  0x24   : > { %v1149_v49 = vsel %vm1148_vm1, %v1116_v9, %v1132_v40  ;;  %v688_v50 = vadd.f32 %v640_v44, %v588_v43  ;;  %1253 = vst.msk [vmem:[%s1659_s29] sm:$0xff] %vm1252_vm2, %v1220_v45  ;;  %v907_v55 = vmul.f32 %v1594_v39, %v1572_v23  ;;  %v908_v56 = vmul.f32 %v1594_v39, %v1580_v28 }
  0x25   : > { %v1182_v53 = vadd.f32 %v1149_v49, %v817_v38  ;;  %v689_v54 = vadd.f32 %v641_v48, %v589_v47  ;;  %v1007_v59 = vmul.f32 %v1566_v21, %v1630_v15  ;;  %v1008_v16 = vmul.f32 %v1566_v21, %v1662_v41  ;;  %v1727_v48 = vld [vmem:[%s1540_s21 + $0x68] sm:$0xff] }
  0x26   : > { %v734_v57 = vrot.slane %v688_v50, 1  ;;  %v316_v60 = vmul.f32 %v1542_v10, %v1569_v22  ;;  %v955_v63 = vadd.f32 %v907_v55, %v855_v51  ;;  %v956_v0 = vadd.f32 %v908_v56, %v856_v52 }
  0x27   : > { %v1221_v61 = vadd.f32 %v1646_v30, %v1182_v53  ;;  %v750_v62 = vrot.slane %v689_v54, 1  ;;  %v352_v3 = vmul.f32 %v1544_v11, %v1580_v28  ;;  %v420_v4 = vmul.f32 %v1546_v12, %v1662_v41 }
  0x28   : > { %v490_v5 = vmul.f32 %v1548_v13, %v1600_v42  ;;  %v542_v6 = vmul.f32 %v1556_v17, %v1618_v58  ;;  %v1055_v7 = vadd.f32 %v1007_v59, %v955_v63  ;;  %v1056_v8 = vadd.f32 %v1008_v16, %v956_v0 }
  0x29   : > { %1254 = vst.msk [vmem:[%s1659_s29 + $0x8] sm:$0xff] %vm1252_vm2, %v1221_v61  ;;  %v801_v22 = vsel %vm783_vm0, %v734_v57, %v750_v62  ;;  %v642_v9 = vmul.f32 %v1558_v18, %v1689_v2  ;;  %v384_v20 = vadd.f32 %v352_v3, %v316_v60  ;;  %v857_v25 = vmul.f32 %v1560_v19, %v1600_v42 }
  0x2a   : > { %v818_v14 = vadd.f32 %v801_v22, %v451_v46  ;;  %v590_v24 = vadd.f32 %v542_v6, %v490_v5  ;;  %v1101_v26 = vrot.slane %v1055_v7, 2  ;;  %v1117_v27 = vrot.slane %v1056_v8, 2 }
  0x2b   : > { %v909_v29 = vmul.f32 %v1594_v39, %v1618_v58  ;;  %v1009_v31 = vmul.f32 %v1566_v21, %v1689_v2  ;;  %v452_v32 = vadd.f32 %v420_v4, %v384_v20  ;;  %v317_v35 = vmul.f32 %v1542_v10, %v1572_v23 }
  0x2c   : > { %v690_v33 = vadd.f32 %v642_v9, %v590_v24  ;;  %v353_v36 = vmul.f32 %v1544_v11, %v1630_v15  ;;  %v1166_v42 = vsel %vm1148_vm1, %v1101_v26, %v1117_v27  ;;  %v421_v38 = vmul.f32 %v1546_v12, %v1712_v34 }
  0x2d   : > { %v957_v37 = vadd.f32 %v909_v29, %v857_v25  ;;  %v491_v40 = vmul.f32 %v1548_v13, %v1572_v23  ;;  %v1183_v43 = vadd.f32 %v1166_v42, %v818_v14  ;;  %v492_v46 = vmul.f32 %v1548_v13, %v1580_v28 }
  0x2e   : > { %v766_v44 = vrot.slane %v690_v33, 1  ;;  %v385_v45 = vadd.f32 %v353_v36, %v317_v35  ;;  %v543_v49 = vmul.f32 %v1556_v17, %v1630_v15  ;;  %v544_v50 = vmul.f32 %v1556_v17, %v1662_v41 }
  0x2f   : > { %v1057_v47 = vadd.f32 %v1009_v31, %v957_v37  ;;  %v643_v51 = vmul.f32 %v1558_v18, %v1712_v34  ;;  %v1222_v52 = vadd.f32 %v1646_v30, %v1183_v43  ;;  %v644_v55 = vmul.f32 %v1558_v18, %v1727_v48  ;;  %v1766_v31 = vld [vmem:[%s1540_s21 + $0x70] sm:$0xff] }
  0x30   : > { %v785_v53 = vsel %vm783_vm0, %v750_v62, %v766_v44  ;;  %v453_v54 = vadd.f32 %v421_v38, %v385_v45  ;;  %v591_v59 = vadd.f32 %v543_v49, %v491_v40  ;;  %v592_v16 = vadd.f32 %v544_v50, %v492_v46 }
  0x31   : > { %v819_v56 = vadd.f32 %v785_v53, %v452_v32  ;;  %v1133_v57 = vrot.slane %v1057_v47, 2  ;;  %1255 = vst.msk [vmem:[%s1659_s29 + $0x10] sm:$0xff] %vm1252_vm2, %v1222_v52  ;;  %v858_v60 = vmul.f32 %v1560_v19, %v1572_v23  ;;  %v859_v61 = vmul.f32 %v1560_v19, %v1580_v28  ;;  %v1785_v47 = vld [vmem:[%s1540_s21 + $0x78] sm:$0xff] }
  0x32   : > { %v910_v63 = vmul.f32 %v1594_v39, %v1630_v15  ;;  %v911_v62 = vmul.f32 %v1594_v39, %v1662_v41  ;;  %v691_v3 = vadd.f32 %v643_v51, %v591_v59  ;;  %v692_v4 = vadd.f32 %v644_v55, %v592_v16 }
  0x33   : > { %v1150_v0 = vsel %vm1148_vm1, %v1117_v27, %v1133_v57  ;;  %v1010_v5 = vmul.f32 %v1566_v21, %v1712_v34  ;;  %v1011_v7 = vmul.f32 %v1566_v21, %v1727_v48  ;;  %v318_v14 = vmul.f32 %v1542_v10, %v1580_v28 }
  0x34   : > { %v1184_v6 = vadd.f32 %v1150_v0, %v819_v56  ;;  %v958_v23 = vadd.f32 %v910_v63, %v858_v60  ;;  %v959_v22 = vadd.f32 %v911_v62, %v859_v61  ;;  %v735_v8 = vrot.slane %v691_v3, 1  ;;  %v1801_v61 = vld [vmem:[%s1540_s21 + $0x80] sm:$0xff] }
  0x35   : > { %v751_v9 = vrot.slane %v692_v4, 1  ;;  %v354_v20 = vmul.f32 %v1544_v11, %v1662_v41  ;;  %v422_v27 = vmul.f32 %v1546_v12, %v1727_v48  ;;  %v493_v28 = vmul.f32 %v1548_v13, %v1618_v58 }
  0x36   : > { %v1223_v24 = vadd.f32 %v1646_v30, %v1184_v6  ;;  %v1058_v25 = vadd.f32 %v1010_v5, %v958_v23  ;;  %v1059_v26 = vadd.f32 %v1011_v7, %v959_v22  ;;  %v545_v33 = vmul.f32 %v1556_v17, %v1689_v2 }
  0x37   : > { %v802_v29 = vsel %vm783_vm0, %v735_v8, %v751_v9  ;;  %v386_v32 = vadd.f32 %v354_v20, %v318_v14  ;;  %v645_v37 = vmul.f32 %v1558_v18, %v1766_v31  ;;  %v860_v43 = vmul.f32 %v1560_v19, %v1618_v58 }
  0x38   : > { %1256 = vst.msk [vmem:[%s1659_s29 + $0x18] sm:$0xff] %vm1252_vm2, %v1223_v24  ;;  %v820_v35 = vadd.f32 %v802_v29, %v453_v54  ;;  %v1102_v36 = vrot.slane %v1058_v25, 2  ;;  %v1118_v42 = vrot.slane %v1059_v26, 2  ;;  %v593_v40 = vadd.f32 %v545_v33, %v493_v28 }
  0x39   : > { %v454_v38 = vadd.f32 %v422_v27, %v386_v32  ;;  %v912_v44 = vmul.f32 %v1594_v39, %v1689_v2  ;;  %v1012_v46 = vmul.f32 %v1566_v21, %v1766_v31  ;;  %v319_v49 = vmul.f32 %v1542_v10, %v1630_v15 }
  0x3a   : > { %v1167_v45 = vsel %vm1148_vm1, %v1102_v36, %v1118_v42  ;;  %v355_v50 = vmul.f32 %v1544_v11, %v1712_v34  ;;  %v693_v58 = vadd.f32 %v645_v37, %v593_v40  ;;  %v423_v53 = vmul.f32 %v1546_v12, %v1785_v47 }
  0x3b   : > { %v1185_v51 = vadd.f32 %v1167_v45, %v820_v35  ;;  %v960_v52 = vadd.f32 %v912_v44, %v860_v43  ;;  %v494_v55 = vmul.f32 %v1548_v13, %v1630_v15  ;;  %v495_v56 = vmul.f32 %v1548_v13, %v1662_v41  ;;  %v1839_v45 = vld [vmem:[%s1540_s21 + $0x88] sm:$0xff] }
  0x3c   : > { %v387_v54 = vadd.f32 %v355_v50, %v319_v49  ;;  %v546_v57 = vmul.f32 %v1556_v17, %v1712_v34  ;;  %v767_v16 = vrot.slane %v693_v58, 1  ;;  %v547_v63 = vmul.f32 %v1556_v17, %v1727_v48 }
  0x3d   : > { %v1224_v59 = vadd.f32 %v1646_v30, %v1185_v51  ;;  %v1060_v60 = vadd.f32 %v1012_v46, %v960_v52  ;;  %v646_v3 = vmul.f32 %v1558_v18, %v1785_v47  ;;  %v647_v4 = vmul.f32 %v1558_v18, %v1801_v61 }
  0x3e   : > { %v455_v62 = vadd.f32 %v423_v53, %v387_v54  ;;  %v594_v0 = vadd.f32 %v546_v57, %v494_v55  ;;  %v786_v5 = vsel %vm783_vm0, %v751_v9, %v767_v16  ;;  %v595_v23 = vadd.f32 %v547_v63, %v495_v56  ;;  %v1852_v56 = vld [vmem:[%s1540_s21 + $0x90] sm:$0xff] }
  0x3f   : > { %1257 = vst.msk [vmem:[%s1659_s29 + $0x20] sm:$0xff] %vm1252_vm2, %v1224_v59  ;;  %v1134_v6 = vrot.slane %v1060_v60, 2  ;;  %v861_v22 = vmul.f32 %v1560_v19, %v1630_v15  ;;  %v821_v7 = vadd.f32 %v786_v5, %v454_v38  ;;  %v862_v14 = vmul.f32 %v1560_v19, %v1662_v41 }
  0x40   : > { %v694_v8 = vadd.f32 %v646_v3, %v594_v0  ;;  %v913_v20 = vmul.f32 %v1594_v39, %v1712_v34  ;;  %v695_v25 = vadd.f32 %v647_v4, %v595_v23  ;;  %v914_v9 = vmul.f32 %v1594_v39, %v1727_v48 }
  0x41   : > { %v1151_v24 = vsel %vm1148_vm1, %v1118_v42, %v1134_v6  ;;  %v1013_v26 = vmul.f32 %v1566_v21, %v1785_v47  ;;  %v1014_v32 = vmul.f32 %v1566_v21, %v1801_v61  ;;  %v320_v35 = vmul.f32 %v1542_v10, %v1662_v41 }
  0x42   : > { %v1186_v15 = vadd.f32 %v1151_v24, %v821_v7  ;;  %v736_v27 = vrot.slane %v694_v8, 1  ;;  %v961_v29 = vadd.f32 %v913_v20, %v861_v22  ;;  %v752_v28 = vrot.slane %v695_v25, 1  ;;  %v1871_v7 = vld [vmem:[%s1540_s21 + $0x98] sm:$0xff] }
  0x43   : > { %v962_v33 = vadd.f32 %v914_v9, %v862_v14  ;;  %v356_v36 = vmul.f32 %v1544_v11, %v1727_v48  ;;  %v424_v38 = vmul.f32 %v1546_v12, %v1801_v61  ;;  %v496_v40 = vmul.f32 %v1548_v13, %v1689_v2 }
  0x44   : > { %v1225_v42 = vadd.f32 %v1646_v30, %v1186_v15  ;;  %v1061_v37 = vadd.f32 %v1013_v26, %v961_v29  ;;  %v803_v43 = vsel %vm783_vm0, %v736_v27, %v752_v28  ;;  %v548_v46 = vmul.f32 %v1556_v17, %v1766_v31 }
  0x45   : > { %v1062_v44 = vadd.f32 %v1014_v32, %v962_v33  ;;  %v388_v41 = vadd.f32 %v356_v36, %v320_v35  ;;  %v822_v49 = vadd.f32 %v803_v43, %v455_v62  ;;  %v648_v51 = vmul.f32 %v1558_v18, %v1839_v45 }
  0x46   : > { %1258 = vst.msk [vmem:[%s1659_s29 + $0x28] sm:$0xff] %vm1252_vm2, %v1225_v42  ;;  %v1103_v50 = vrot.slane %v1061_v37, 2  ;;  %v863_v58 = vmul.f32 %v1560_v19, %v1689_v2  ;;  %v596_v54 = vadd.f32 %v548_v46, %v496_v40  ;;  %v915_v55 = vmul.f32 %v1594_v39, %v1766_v31 }
  0x47   : > { %v1119_v52 = vrot.slane %v1062_v44, 2  ;;  %v456_v53 = vadd.f32 %v424_v38, %v388_v41  ;;  %v1015_v57 = vmul.f32 %v1566_v21, %v1839_v45  ;;  %v321_v59 = vmul.f32 %v1542_v10, %v1712_v34 }
  0x48   : > { %v357_v16 = vmul.f32 %v1544_v11, %v1785_v47  ;;  %v425_v2 = vmul.f32 %v1546_v12, %v1852_v56  ;;  %v696_v63 = vadd.f32 %v648_v51, %v596_v54  ;;  %v963_v62 = vadd.f32 %v915_v55, %v863_v58 }
  0x49   : > { %v1168_v60 = vsel %vm1148_vm1, %v1103_v50, %v1119_v52  ;;  %v497_v0 = vmul.f32 %v1548_v13, %v1712_v34  ;;  %v498_v5 = vmul.f32 %v1548_v13, %v1727_v48  ;;  %v549_v6 = vmul.f32 %v1556_v17, %v1785_v47 }
  0x4a   : > { %v1187_v3 = vadd.f32 %v1168_v60, %v822_v49  ;;  %v389_v4 = vadd.f32 %v357_v16, %v321_v59  ;;  %v768_v23 = vrot.slane %v696_v63, 1  ;;  %v1063_v22 = vadd.f32 %v1015_v57, %v963_v62  ;;  %v1910_v57 = vld [vmem:[%s1540_s21 + $0xa0] sm:$0xff] }
  0x4b   : > { %v550_v8 = vmul.f32 %v1556_v17, %v1801_v61  ;;  %v649_v14 = vmul.f32 %v1558_v18, %v1852_v56  ;;  %v597_v25 = vadd.f32 %v549_v6, %v497_v0  ;;  %v650_v9 = vmul.f32 %v1558_v18, %v1871_v7 }
  0x4c   : > { %v1226_v20 = vadd.f32 %v1646_v30, %v1187_v3  ;;  %v457_v24 = vadd.f32 %v425_v2, %v389_v4  ;;  %v787_v26 = vsel %vm783_vm0, %v752_v28, %v768_v23  ;;  %v1135_v15 = vrot.slane %v1063_v22, 2 }
  0x4d   : > { %v598_v27 = vadd.f32 %v550_v8, %v498_v5  ;;  %v864_v29 = vmul.f32 %v1560_v19, %v1712_v34  ;;  %v823_v32 = vadd.f32 %v787_v26, %v456_v53  ;;  %v697_v33 = vadd.f32 %v649_v14, %v597_v25  ;;  %v1923_v5 = vld [vmem:[%s1540_s21 + $0xa8] sm:$0xff] }
  0x4e   : > { %1259 = vst.msk [vmem:[%s1659_s29 + $0x30] sm:$0xff] %vm1252_vm2, %v1226_v20  ;;  %v865_v35 = vmul.f32 %v1560_v19, %v1727_v48  ;;  %v916_v36 = vmul.f32 %v1594_v39, %v1785_v47  ;;  %v1152_v42 = vsel %vm1148_vm1, %v1119_v52, %v1135_v15  ;;  %v917_v28 = vmul.f32 %v1594_v39, %v1801_v61 }
  0x4f   : > { %v698_v37 = vadd.f32 %v650_v9, %v598_v27  ;;  %v1016_v34 = vmul.f32 %v1566_v21, %v1852_v56  ;;  %v1188_v38 = vadd.f32 %v1152_v42, %v823_v32  ;;  %v737_v40 = vrot.slane %v697_v33, 1  ;;  %v1942_v32 = vld [vmem:[%s1540_s21 + $0xb0] sm:$0xff] }
  0x50   : > { %v964_v43 = vadd.f32 %v916_v36, %v864_v29  ;;  %v1017_v44 = vmul.f32 %v1566_v21, %v1871_v7  ;;  %v965_v46 = vadd.f32 %v917_v28, %v865_v35  ;;  %v322_v49 = vmul.f32 %v1542_v10, %v1727_v48 }
  0x51   : > { %v753_v41 = vrot.slane %v698_v37, 1  ;;  %v358_v50 = vmul.f32 %v1544_v11, %v1801_v61  ;;  %v1227_v51 = vadd.f32 %v1646_v30, %v1188_v38  ;;  %v426_v52 = vmul.f32 %v1546_v12, %v1871_v7 }
  0x52   : > { %v1064_v58 = vadd.f32 %v1016_v34, %v964_v43  ;;  %v499_v53 = vmul.f32 %v1548_v13, %v1766_v31  ;;  %v1065_v55 = vadd.f32 %v1017_v44, %v965_v46  ;;  %v551_v59 = vmul.f32 %v1556_v17, %v1839_v45 }
  0x53   : > { %v804_v54 = vsel %vm783_vm0, %v737_v40, %v753_v41  ;;  %v390_v48 = vadd.f32 %v358_v50, %v322_v49  ;;  %1260 = vst.msk [vmem:[%s1659_s29 + $0x38] sm:$0xff] %vm1252_vm2, %v1227_v51  ;;  %v651_v60 = vmul.f32 %v1558_v18, %v1910_v57  ;;  %v866_v63 = vmul.f32 %v1560_v19, %v1766_v31 }
  0x54   : > { %v824_v16 = vadd.f32 %v804_v54, %v457_v24  ;;  %v1104_v2 = vrot.slane %v1064_v58, 2  ;;  %v1120_v62 = vrot.slane %v1065_v55, 2  ;;  %v599_v3 = vadd.f32 %v551_v59, %v499_v53 }
  0x55   : > { %v458_v0 = vadd.f32 %v426_v52, %v390_v48  ;;  %v918_v4 = vmul.f32 %v1594_v39, %v1839_v45  ;;  %v1018_v6 = vmul.f32 %v1566_v21, %v1910_v57  ;;  %v323_v23 = vmul.f32 %v1542_v10, %v1785_v47 }
  0x56   : > { %v359_v22 = vmul.f32 %v1544_v11, %v1852_v56  ;;  %v427_v31 = vmul.f32 %v1546_v12, %v1923_v5  ;;  %v1169_v8 = vsel %vm1148_vm1, %v1104_v2, %v1120_v62  ;;  %v699_v14 = vadd.f32 %v651_v60, %v599_v3 }
  0x57   : > { %v966_v20 = vadd.f32 %v918_v4, %v866_v63  ;;  %v500_v24 = vmul.f32 %v1548_v13, %v1785_v47  ;;  %v1189_v25 = vadd.f32 %v1169_v8, %v824_v16  ;;  %v501_v26 = vmul.f32 %v1548_v13, %v1801_v61 }
  0x58   : > { %v391_v9 = vadd.f32 %v359_v22, %v323_v23  ;;  %v552_v15 = vmul.f32 %v1556_v17, %v1852_v56  ;;  %v769_v27 = vrot.slane %v699_v14, 1  ;;  %v553_v33 = vmul.f32 %v1556_v17, %v1871_v7 }
  0x59   : > { %v1066_v29 = vadd.f32 %v1018_v6, %v966_v20  ;;  %v652_v35 = vmul.f32 %v1558_v18, %v1923_v5  ;;  %v1228_v36 = vadd.f32 %v1646_v30, %v1189_v25  ;;  %v653_v28 = vmul.f32 %v1558_v18, %v1942_v32  ;;  %v1981_v6 = vld [vmem:[%s1540_s21 + $0xb8] sm:$0xff] }
  0x5a   : > { %v459_v42 = vadd.f32 %v427_v31, %v391_v9  ;;  %v600_v37 = vadd.f32 %v552_v15, %v500_v24  ;;  %v788_v34 = vsel %vm783_vm0, %v753_v41, %v769_v27  ;;  %v601_v40 = vadd.f32 %v553_v33, %v501_v26  ;;  %v1994_v26 = vld [vmem:[%s1540_s21 + $0xc0] sm:$0xff] }
  0x5b   : > { %v1136_v38 = vrot.slane %v1066_v29, 2  ;;  %v867_v43 = vmul.f32 %v1560_v19, %v1785_v47  ;;  %1261 = vst.msk [vmem:[%s1659_s29 + $0x40] sm:$0xff] %vm1252_vm2, %v1228_v36  ;;  %v825_v44 = vadd.f32 %v788_v34, %v458_v0  ;;  %v868_v49 = vmul.f32 %v1560_v19, %v1801_v61 }
  0x5c   : > { %v700_v46 = vadd.f32 %v652_v35, %v600_v37  ;;  %v919_v50 = vmul.f32 %v1594_v39, %v1852_v56  ;;  %v701_v58 = vadd.f32 %v653_v28, %v601_v40  ;;  %v920_v41 = vmul.f32 %v1594_v39, %v1871_v7 }
  0x5d   : > { %v1153_v51 = vsel %vm1148_vm1, %v1120_v62, %v1136_v38  ;;  %v1019_v47 = vmul.f32 %v1566_v21, %v1923_v5  ;;  %v1020_v55 = vmul.f32 %v1566_v21, %v1942_v32  ;;  %v324_v16 = vmul.f32 %v1542_v10, %v1801_v61 }
  0x5e   : > { %v1190_v52 = vadd.f32 %v1153_v51, %v825_v44  ;;  %v738_v53 = vrot.slane %v700_v46, 1  ;;  %v967_v54 = vadd.f32 %v919_v50, %v867_v43  ;;  %v754_v48 = vrot.slane %v701_v58, 1  ;;  %v2013_v44 = vld [vmem:[%s1540_s21 + $0xc8] sm:$0xff] }
  0x5f   : > { %v968_v59 = vadd.f32 %v920_v41, %v868_v49  ;;  %v360_v2 = vmul.f32 %v1544_v11, %v1871_v7  ;;  %v428_v62 = vmul.f32 %v1546_v12, %v1942_v32  ;;  %v502_v0 = vmul.f32 %v1548_v13, %v1839_v45 }
  0x60   : > { %v1229_v60 = vadd.f32 %v1646_v30, %v1190_v52  ;;  %v1067_v63 = vadd.f32 %v1019_v47, %v967_v54  ;;  %v805_v3 = vsel %vm783_vm0, %v738_v53, %v754_v48  ;;  %v554_v23 = vmul.f32 %v1556_v17, %v1910_v57 }
  0x61   : > { %v1068_v4 = vadd.f32 %v1020_v55, %v968_v59  ;;  %v392_v61 = vadd.f32 %v360_v2, %v324_v16  ;;  %v826_v22 = vadd.f32 %v805_v3, %v459_v42  ;;  %v654_v8 = vmul.f32 %v1558_v18, %v1981_v6 }
  0x62   : > { %1262 = vst.msk [vmem:[%s1659_s29 + $0x48] sm:$0xff] %vm1252_vm2, %v1229_v60  ;;  %v1105_v31 = vrot.slane %v1067_v63, 2  ;;  %v869_v14 = vmul.f32 %v1560_v19, %v1839_v45  ;;  %v602_v25 = vadd.f32 %v554_v23, %v502_v0  ;;  %v921_v9 = vmul.f32 %v1594_v39, %v1910_v57 }
  0x63   : > { %v1121_v20 = vrot.slane %v1068_v4, 2  ;;  %v460_v24 = vadd.f32 %v428_v62, %v392_v61  ;;  %v1021_v15 = vmul.f32 %v1566_v21, %v1981_v6  ;;  %v325_v27 = vmul.f32 %v1542_v10, %v1852_v56 }
  0x64   : > { %v361_v29 = vmul.f32 %v1544_v11, %v1923_v5  ;;  %v429_v45 = vmul.f32 %v1546_v12, %v1994_v26  ;;  %v702_v35 = vadd.f32 %v654_v8, %v602_v25  ;;  %v969_v36 = vadd.f32 %v921_v9, %v869_v14 }
  0x65   : > { %v1170_v33 = vsel %vm1148_vm1, %v1105_v31, %v1121_v20  ;;  %v503_v42 = vmul.f32 %v1548_v13, %v1852_v56  ;;  %v504_v34 = vmul.f32 %v1548_v13, %v1871_v7  ;;  %v555_v38 = vmul.f32 %v1556_v17, %v1923_v5 }
  0x66   : > { %v1191_v37 = vadd.f32 %v1170_v33, %v826_v22  ;;  %v393_v28 = vadd.f32 %v361_v29, %v325_v27  ;;  %v770_v40 = vrot.slane %v702_v35, 1  ;;  %v1069_v43 = vadd.f32 %v1021_v15, %v969_v36  ;;  %v2052_v15 = vld [vmem:[%s1540_s21 + $0xd0] sm:$0xff] }
  0x67   : > { %v556_v46 = vmul.f32 %v1556_v17, %v1942_v32  ;;  %v655_v49 = vmul.f32 %v1558_v18, %v1994_v26  ;;  %v603_v58 = vadd.f32 %v555_v38, %v503_v42  ;;  %v656_v41 = vmul.f32 %v1558_v18, %v2013_v44 }
  0x68   : > { %v1230_v50 = vadd.f32 %v1646_v30, %v1191_v37  ;;  %v461_v51 = vadd.f32 %v429_v45, %v393_v28  ;;  %v789_v47 = vsel %vm783_vm0, %v754_v48, %v770_v40  ;;  %v1137_v52 = vrot.slane %v1069_v43, 2 }
  0x69   : > { %v604_v53 = vadd.f32 %v556_v46, %v504_v34  ;;  %v870_v54 = vmul.f32 %v1560_v19, %v1852_v56  ;;  %v827_v55 = vadd.f32 %v789_v47, %v460_v24  ;;  %v703_v59 = vadd.f32 %v655_v49, %v603_v58  ;;  %v2065_v34 = vld [vmem:[%s1540_s21 + $0xd8] sm:$0xff] }
  0x6a   : > { %1263 = vst.msk [vmem:[%s1659_s29 + $0x50] sm:$0xff] %vm1252_vm2, %v1230_v50  ;;  %v871_v16 = vmul.f32 %v1560_v19, %v1871_v7  ;;  %v922_v2 = vmul.f32 %v1594_v39, %v1923_v5  ;;  %v1154_v60 = vsel %vm1148_vm1, %v1121_v20, %v1137_v52  ;;  %v923_v48 = vmul.f32 %v1594_v39, %v1942_v32 }
  0x6b   : > { %v704_v63 = vadd.f32 %v656_v41, %v604_v53  ;;  %v1022_v56 = vmul.f32 %v1566_v21, %v1994_v26  ;;  %v1192_v62 = vadd.f32 %v1154_v60, %v827_v55  ;;  %v739_v0 = vrot.slane %v703_v59, 1  ;;  %v2084_v55 = vld [vmem:[%s1540_s21 + $0xe0] sm:$0xff] }
  0x6c   : > { %v970_v3 = vadd.f32 %v922_v2, %v870_v54  ;;  %v1023_v4 = vmul.f32 %v1566_v21, %v2013_v44  ;;  %v971_v23 = vadd.f32 %v923_v48, %v871_v16  ;;  %v326_v22 = vmul.f32 %v1542_v10, %v1871_v7 }
  0x6d   : > { %v755_v61 = vrot.slane %v704_v63, 1  ;;  %v362_v31 = vmul.f32 %v1544_v11, %v1942_v32  ;;  %v1231_v8 = vadd.f32 %v1646_v30, %v1192_v62  ;;  %v430_v20 = vmul.f32 %v1546_v12, %v2013_v44 }
  0x6e   : > { %v1070_v14 = vadd.f32 %v1022_v56, %v970_v3  ;;  %v505_v24 = vmul.f32 %v1548_v13, %v1910_v57  ;;  %v1071_v9 = vadd.f32 %v1023_v4, %v971_v23  ;;  %v557_v27 = vmul.f32 %v1556_v17, %v1981_v6 }
  0x6f   : > { %v806_v25 = vsel %vm783_vm0, %v739_v0, %v755_v61  ;;  %v394_v7 = vadd.f32 %v362_v31, %v326_v22  ;;  %1264 = vst.msk [vmem:[%s1659_s29 + $0x58] sm:$0xff] %vm1252_vm2, %v1231_v8  ;;  %v657_v33 = vmul.f32 %v1558_v18, %v2052_v15  ;;  %v872_v35 = vmul.f32 %v1560_v19, %v1910_v57 }
  0x70   : > { %v828_v29 = vadd.f32 %v806_v25, %v461_v51  ;;  %v1106_v45 = vrot.slane %v1070_v14, 2  ;;  %v1122_v36 = vrot.slane %v1071_v9, 2  ;;  %v605_v37 = vadd.f32 %v557_v27, %v505_v24 }
  0x71   : > { %v462_v42 = vadd.f32 %v430_v20, %v394_v7  ;;  %v924_v28 = vmul.f32 %v1594_v39, %v1981_v6  ;;  %v1024_v38 = vmul.f32 %v1566_v21, %v2052_v15  ;;  %v327_v40 = vmul.f32 %v1542_v10, %v1923_v5 }
  0x72   : > { %v363_v43 = vmul.f32 %v1544_v11, %v1994_v26  ;;  %v431_v57 = vmul.f32 %v1546_v12, %v2065_v34  ;;  %v1171_v46 = vsel %vm1148_vm1, %v1106_v45, %v1122_v36  ;;  %v705_v49 = vadd.f32 %v657_v33, %v605_v37 }
  0x73   : > { %v972_v50 = vadd.f32 %v924_v28, %v872_v35  ;;  %v506_v51 = vmul.f32 %v1548_v13, %v1923_v5  ;;  %v1193_v58 = vadd.f32 %v1171_v46, %v828_v29  ;;  %v507_v47 = vmul.f32 %v1548_v13, %v1942_v32 }
  0x74   : > { %v395_v41 = vadd.f32 %v363_v43, %v327_v40  ;;  %v558_v52 = vmul.f32 %v1556_v17, %v1994_v26  ;;  %v771_v53 = vrot.slane %v705_v49, 1  ;;  %v559_v59 = vmul.f32 %v1556_v17, %v2013_v44 }
  0x75   : > { %v1072_v54 = vadd.f32 %v1024_v38, %v972_v50  ;;  %v658_v16 = vmul.f32 %v1558_v18, %v2065_v34  ;;  %v1232_v2 = vadd.f32 %v1646_v30, %v1193_v58  ;;  %v659_v48 = vmul.f32 %v1558_v18, %v2084_v55  ;;  %v2123_v38 = vld [vmem:[%s1540_s21 + $0xe8] sm:$0xff] }
  0x76   : > { %v463_v60 = vadd.f32 %v431_v57, %v395_v41  ;;  %v606_v63 = vadd.f32 %v558_v52, %v506_v51  ;;  %v790_v56 = vsel %vm783_vm0, %v755_v61, %v771_v53  ;;  %v607_v0 = vadd.f32 %v559_v59, %v507_v47  ;;  %v2136_v47 = vld [vmem:[%s1540_s21 + $0xf0] sm:$0xff] }
  0x77   : > { %v1138_v62 = vrot.slane %v1072_v54, 2  ;;  %v873_v3 = vmul.f32 %v1560_v19, %v1923_v5  ;;  %1265 = vst.msk [vmem:[%s1659_s29 + $0x60] sm:$0xff] %vm1252_vm2, %v1232_v2  ;;  %v829_v4 = vadd.f32 %v790_v56, %v462_v42  ;;  %v874_v22 = vmul.f32 %v1560_v19, %v1942_v32 }
  0x78   : > { %v706_v23 = vadd.f32 %v658_v16, %v606_v63  ;;  %v925_v31 = vmul.f32 %v1594_v39, %v1994_v26  ;;  %v707_v14 = vadd.f32 %v659_v48, %v607_v0  ;;  %v926_v61 = vmul.f32 %v1594_v39, %v2013_v44 }
  0x79   : > { %v1155_v8 = vsel %vm1148_vm1, %v1122_v36, %v1138_v62  ;;  %v1025_v5 = vmul.f32 %v1566_v21, %v2065_v34  ;;  %v1026_v9 = vmul.f32 %v1566_v21, %v2084_v55  ;;  %v328_v29 = vmul.f32 %v1542_v10, %v1942_v32 }
  0x7a   : > { %v1194_v20 = vadd.f32 %v1155_v8, %v829_v4  ;;  %v740_v24 = vrot.slane %v706_v23, 1  ;;  %v973_v25 = vadd.f32 %v925_v31, %v873_v3  ;;  %v756_v7 = vrot.slane %v707_v14, 1  ;;  %v2155_v3 = vld [vmem:[%s1540_s21 + $0xf8] sm:$0xff] }
  0x7b   : > { %v974_v27 = vadd.f32 %v926_v61, %v874_v22  ;;  %v364_v45 = vmul.f32 %v1544_v11, %v2013_v44  ;;  %v432_v36 = vmul.f32 %v1546_v12, %v2084_v55  ;;  %v508_v42 = vmul.f32 %v1548_v13, %v1981_v6 }
  0x7c   : > { %v1233_v33 = vadd.f32 %v1646_v30, %v1194_v20  ;;  %v1073_v35 = vadd.f32 %v1025_v5, %v973_v25  ;;  %v807_v37 = vsel %vm783_vm0, %v740_v24, %v756_v7  ;;  %v560_v40 = vmul.f32 %v1556_v17, %v2052_v15 }
  0x7d   : > { %v1074_v28 = vadd.f32 %v1026_v9, %v974_v27  ;;  %v396_v32 = vadd.f32 %v364_v45, %v328_v29  ;;  %v830_v43 = vadd.f32 %v807_v37, %v463_v60  ;;  %v660_v46 = vmul.f32 %v1558_v18, %v2123_v38 }
  0x7e   : > { %1266 = vst.msk [vmem:[%s1659_s29 + $0x68] sm:$0xff] %vm1252_vm2, %v1233_v33  ;;  %v1107_v57 = vrot.slane %v1073_v35, 2  ;;  %v875_v49 = vmul.f32 %v1560_v19, %v1981_v6  ;;  %v608_v58 = vadd.f32 %v560_v40, %v508_v42  ;;  %v927_v41 = vmul.f32 %v1594_v39, %v2052_v15 }
  0x7f   : > { %v1123_v50 = vrot.slane %v1074_v28, 2  ;;  %v464_v51 = vadd.f32 %v432_v36, %v396_v32  ;;  %v1027_v52 = vmul.f32 %v1566_v21, %v2123_v38  ;;  %v329_v53 = vmul.f32 %v1542_v10, %v1994_v26 }
  0x80   : > { %v365_v54 = vmul.f32 %v1544_v11, %v2065_v34  ;;  %v433_v6 = vmul.f32 %v1546_v12, %v2136_v47  ;;  %v708_v16 = vadd.f32 %v660_v46, %v608_v58  ;;  %v975_v2 = vadd.f32 %v927_v41, %v875_v49 }
  0x81   : > { %v1172_v59 = vsel %vm1148_vm1, %v1107_v57, %v1123_v50  ;;  %v509_v60 = vmul.f32 %v1548_v13, %v1994_v26  ;;  %v510_v21 = vmul.f32 %v1548_v13, %v2013_v44  ;;  %v561_v56 = vmul.f32 %v1556_v17, %v2065_v34 }
  0x82   : > { %v1195_v63 = vadd.f32 %v1172_v59, %v830_v43  ;;  %v397_v48 = vadd.f32 %v365_v54, %v329_v53  ;;  %v772_v62 = vrot.slane %v708_v16, 1  ;;  %v1075_v0 = vadd.f32 %v1027_v52, %v975_v2  ;;  %v2199_v52 = vld [vmem:[%s1540_s21 + $0x100] sm:$0xff] }
  0x83   : > { %v562_v4 = vmul.f32 %v1556_v17, %v2084_v55  ;;  %v661_v23 = vmul.f32 %v1558_v18, %v2136_v47  ;;  %v609_v8 = vadd.f32 %v561_v56, %v509_v60  ;;  %v662_v14 = vmul.f32 %v1558_v18, %v2155_v3 }
  0x84   : > { %v1234_v22 = vadd.f32 %v1646_v30, %v1195_v63  ;;  %v465_v31 = vadd.f32 %v433_v6, %v397_v48  ;;  %v791_v61 = vsel %vm783_vm0, %v756_v7, %v772_v62  ;;  %v1139_v5 = vrot.slane %v1075_v0, 2 }
  0x85   : > { %v610_v20 = vadd.f32 %v562_v4, %v510_v21  ;;  %v876_v24 = vmul.f32 %v1560_v19, %v1994_v26  ;;  %v831_v25 = vadd.f32 %v791_v61, %v464_v51  ;;  %v709_v9 = vadd.f32 %v661_v23, %v609_v8  ;;  %v2181_v26 = vld [vmem:[%s2723_s1 + $0x8] ss:$0 sm:$0xff] }
  0x86   : > { %1267 = vst.msk [vmem:[%s1659_s29 + $0x70] sm:$0xff] %vm1252_vm2, %v1234_v22  ;;  %v877_v27 = vmul.f32 %v1560_v19, %v2013_v44  ;;  %v928_v29 = vmul.f32 %v1594_v39, %v2065_v34  ;;  %v1156_v45 = vsel %vm1148_vm1, %v1123_v50, %v1139_v5  ;;  %v929_v7 = vmul.f32 %v1594_v39, %v2084_v55  ;;  %v2212_v21 = vld [vmem:[%s1540_s21 + $0x108] sm:$0xff] }
  0x87   : > { %v710_v33 = vadd.f32 %v662_v14, %v610_v20  ;;  %v1028_v35 = vmul.f32 %v2181_v26, %v2136_v47  ;;  %v1196_v36 = vadd.f32 %v1156_v45, %v831_v25  ;;  %v741_v42 = vrot.slane %v709_v9, 1  ;;  %v2231_v25 = vld [vmem:[%s1540_s21 + $0x110] sm:$0xff] }
  0x88   : > { %v976_v37 = vadd.f32 %v928_v29, %v876_v24  ;;  %v1029_v28 = vmul.f32 %v2181_v26, %v2155_v3  ;;  %v977_v40 = vadd.f32 %v929_v7, %v877_v27  ;;  %v330_v43 = vmul.f32 %v1542_v10, %v2013_v44 }
  0x89   : > { %v757_v32 = vrot.slane %v710_v33, 1  ;;  %v366_v57 = vmul.f32 %v1544_v11, %v2084_v55  ;;  %v1235_v46 = vadd.f32 %v1646_v30, %v1196_v36  ;;  %v434_v50 = vmul.f32 %v1546_v12, %v2155_v3 }
  0x8a   : > { %v1076_v49 = vadd.f32 %v1028_v35, %v976_v37  ;;  %v511_v51 = vmul.f32 %v1548_v13, %v2052_v15  ;;  %v1077_v41 = vadd.f32 %v1029_v28, %v977_v40  ;;  %v563_v53 = vmul.f32 %v1556_v17, %v2123_v38 }
  0x8b   : > { %v808_v58 = vsel %vm783_vm0, %v741_v42, %v757_v32  ;;  %v398_v44 = vadd.f32 %v366_v57, %v330_v43  ;;  %1268 = vst.msk [vmem:[%s1659_s29 + $0x78] sm:$0xff] %vm1252_vm2, %v1235_v46  ;;  %v663_v59 = vmul.f32 %v1558_v18, %v2199_v52  ;;  %v878_v16 = vmul.f32 %v1560_v19, %v2052_v15 }
  0x8c   : > { %v832_v54 = vadd.f32 %v808_v58, %v465_v31  ;;  %v1108_v6 = vrot.slane %v1076_v49, 2  ;;  %v1124_v2 = vrot.slane %v1077_v41, 2  ;;  %v611_v63 = vadd.f32 %v563_v53, %v511_v51 }
  0x8d   : > { %v466_v60 = vadd.f32 %v434_v50, %v398_v44  ;;  %v930_v48 = vmul.f32 %v1594_v39, %v2123_v38  ;;  %v1030_v56 = vmul.f32 %v2181_v26, %v2199_v52  ;;  %v331_v62 = vmul.f32 %v1542_v10, %v2065_v34 }
  0x8e   : > { %v367_v0 = vmul.f32 %v1544_v11, %v2136_v47  ;;  %v435_v15 = vmul.f32 %v1546_v12, %v2212_v21  ;;  %v1173_v4 = vsel %vm1148_vm1, %v1108_v6, %v1124_v2  ;;  %v711_v23 = vadd.f32 %v663_v59, %v611_v63  ;;  %v2265_v6 = vld [vmem:[%s2724_s2] ss:$0 sm:$0xff] }
  0x8f   : > { %v978_v22 = vadd.f32 %v930_v48, %v878_v16  ;;  %v512_v31 = vmul.f32 %v1548_v13, %v2065_v34  ;;  %v1197_v8 = vadd.f32 %v1173_v4, %v832_v54  ;;  %v513_v61 = vmul.f32 %v1548_v13, %v2084_v55  ;;  %v2275_v48 = vld [vmem:[%s1540_s21 + $0x118] sm:$0xff] }
  0x90   : > { %v399_v14 = vadd.f32 %v367_v0, %v331_v62  ;;  %v564_v5 = vmul.f32 %v1556_v17, %v2136_v47  ;;  %v773_v20 = vrot.slane %v711_v23, 1  ;;  %v565_v9 = vmul.f32 %v1556_v17, %v2155_v3 }
  0x91   : > { %v1078_v24 = vadd.f32 %v1030_v56, %v978_v22  ;;  %v664_v27 = vmul.f32 %v1558_v18, %v2212_v21  ;;  %v1236_v29 = vadd.f32 %v1646_v30, %v1197_v8  ;;  %v665_v7 = vmul.f32 %v1558_v18, %v2231_v25 }
  0x92   : > { %v467_v45 = vadd.f32 %v435_v15, %v399_v14  ;;  %v612_v33 = vadd.f32 %v564_v5, %v512_v31  ;;  %v792_v35 = vsel %vm783_vm0, %v757_v32, %v773_v20  ;;  %v613_v42 = vadd.f32 %v565_v9, %v513_v61  ;;  %v2288_v61 = vld [vmem:[%s1540_s21 + $0x120] sm:$0xff] }
  0x93   : > { %v1140_v36 = vrot.slane %v1078_v24, 2  ;;  %v879_v37 = vmul.f32 %v1560_v19, %v2065_v34  ;;  %1269 = vst.msk [vmem:[%s1659_s29 + $0x80] sm:$0xff] %vm1252_vm2, %v1236_v29  ;;  %v833_v28 = vadd.f32 %v792_v35, %v466_v60  ;;  %v880_v30 = vmul.f32 %v1560_v19, %v2084_v55 }
  0x94   : > { %v712_v40 = vadd.f32 %v664_v27, %v612_v33  ;;  %v931_v43 = vmul.f32 %v1594_v39, %v2136_v47  ;;  %v713_v46 = vadd.f32 %v665_v7, %v613_v42  ;;  %v932_v32 = vmul.f32 %v1594_v39, %v2155_v3 }
  0x95   : > { %v1157_v57 = vsel %vm1148_vm1, %v1124_v2, %v1140_v36  ;;  %v1031_v34 = vmul.f32 %v2181_v26, %v2212_v21  ;;  %v1032_v58 = vmul.f32 %v2181_v26, %v2231_v25  ;;  %v332_v53 = vmul.f32 %v1542_v10, %v2084_v55 }
  0x96   : > { %v1198_v49 = vadd.f32 %v1157_v57, %v833_v28  ;;  %v742_v50 = vrot.slane %v712_v40, 1  ;;  %v979_v51 = vadd.f32 %v931_v43, %v879_v37  ;;  %v758_v41 = vrot.slane %v713_v46, 1  ;;  %v2307_v28 = vld [vmem:[%s1540_s21 + $0x128] sm:$0xff] }
  0x97   : > { %v980_v44 = vadd.f32 %v932_v32, %v880_v30  ;;  %v368_v54 = vmul.f32 %v1544_v11, %v2155_v3  ;;  %v436_v2 = vmul.f32 %v1546_v12, %v2231_v25  ;;  %v514_v60 = vmul.f32 %v1548_v13, %v2123_v38 }
  0x98   : > { %v1237_v59 = vadd.f32 %v2265_v6, %v1198_v49  ;;  %v1079_v16 = vadd.f32 %v1031_v34, %v979_v51  ;;  %v809_v55 = vsel %vm783_vm0, %v742_v50, %v758_v41  ;;  %v566_v62 = vmul.f32 %v1556_v17, %v2199_v52 }
  0x99   : > { %v1080_v63 = vadd.f32 %v1032_v58, %v980_v44  ;;  %v400_v56 = vadd.f32 %v368_v54, %v332_v53  ;;  %v834_v0 = vadd.f32 %v809_v55, %v467_v45  ;;  %v666_v4 = vmul.f32 %v1558_v18, %v2275_v48 }
  0x9a   : > { %1270 = vst.msk [vmem:[%s1659_s29 + $0x88] sm:$0xff] %vm1252_vm2, %v1237_v59  ;;  %v1109_v15 = vrot.slane %v1079_v16, 2  ;;  %v881_v23 = vmul.f32 %v1560_v19, %v2123_v38  ;;  %v614_v8 = vadd.f32 %v566_v62, %v514_v60  ;;  %v933_v14 = vmul.f32 %v1594_v39, %v2199_v52 }
  0x9b   : > { %v1125_v22 = vrot.slane %v1080_v63, 2  ;;  %v468_v31 = vadd.f32 %v436_v2, %v400_v56  ;;  %v1033_v5 = vmul.f32 %v2181_v26, %v2275_v48  ;;  %v333_v20 = vmul.f32 %v1542_v10, %v2136_v47 }
  0x9c   : > { %v369_v24 = vmul.f32 %v1544_v11, %v2212_v21  ;;  %v437_v38 = vmul.f32 %v1546_v12, %v2288_v61  ;;  %v714_v27 = vadd.f32 %v666_v4, %v614_v8  ;;  %v981_v29 = vadd.f32 %v933_v14, %v881_v23 }
  0x9d   : > { %v1174_v9 = vsel %vm1148_vm1, %v1109_v15, %v1125_v22  ;;  %v515_v45 = vmul.f32 %v1548_v13, %v2136_v47  ;;  %v516_v35 = vmul.f32 %v1548_v13, %v2155_v3  ;;  %v567_v36 = vmul.f32 %v1556_v17, %v2212_v21 }
  0x9e   : > { %v1199_v33 = vadd.f32 %v1174_v9, %v834_v0  ;;  %v401_v7 = vadd.f32 %v369_v24, %v333_v20  ;;  %v774_v42 = vrot.slane %v714_v27, 1  ;;  %v1081_v37 = vadd.f32 %v1033_v5, %v981_v29  ;;  %v2346_v5 = vld [vmem:[%s1540_s21 + $0x130] sm:$0xff] }
  0x9f   : > { %v568_v40 = vmul.f32 %v1556_v17, %v2231_v25  ;;  %v667_v30 = vmul.f32 %v1558_v18, %v2288_v61  ;;  %v615_v46 = vadd.f32 %v567_v36, %v515_v45  ;;  %v668_v32 = vmul.f32 %v1558_v18, %v2307_v28 }
  0xa0   : > { %v1238_v43 = vadd.f32 %v2265_v6, %v1199_v33  ;;  %v469_v57 = vadd.f32 %v437_v38, %v401_v7  ;;  %v793_v34 = vsel %vm783_vm0, %v758_v41, %v774_v42  ;;  %v1141_v49 = vrot.slane %v1081_v37, 2 }
  0xa1   : > { %v616_v50 = vadd.f32 %v568_v40, %v516_v35  ;;  %v882_v51 = vmul.f32 %v1560_v19, %v2136_v47  ;;  %v835_v58 = vadd.f32 %v793_v34, %v468_v31  ;;  %v715_v44 = vadd.f32 %v667_v30, %v615_v46  ;;  %v2359_v35 = vld [vmem:[%s1540_s21 + $0x138] sm:$0xff] }
  0xa2   : > { %1271 = vst.msk [vmem:[%s1659_s29 + $0x90] sm:$0xff] %vm1252_vm2, %v1238_v43  ;;  %v883_v53 = vmul.f32 %v1560_v19, %v2155_v3  ;;  %v934_v54 = vmul.f32 %v1594_v39, %v2212_v21  ;;  %v1158_v59 = vsel %vm1148_vm1, %v1125_v22, %v1141_v49  ;;  %v935_v41 = vmul.f32 %v1594_v39, %v2231_v25 }
  0xa3   : > { %v716_v16 = vadd.f32 %v668_v32, %v616_v50  ;;  %v1034_v47 = vmul.f32 %v2181_v26, %v2288_v61  ;;  %v1200_v2 = vadd.f32 %v1158_v59, %v835_v58  ;;  %v743_v60 = vrot.slane %v715_v44, 1  ;;  %v2378_v58 = vld [vmem:[%s1540_s21 + $0x140] sm:$0xff] }
  0xa4   : > { %v982_v55 = vadd.f32 %v934_v54, %v882_v51  ;;  %v1035_v63 = vmul.f32 %v2181_v26, %v2307_v28  ;;  %v983_v62 = vadd.f32 %v935_v41, %v883_v53  ;;  %v334_v0 = vmul.f32 %v1542_v10, %v2155_v3 }
  0xa5   : > { %v759_v56 = vrot.slane %v716_v16, 1  ;;  %v370_v15 = vmul.f32 %v1544_v11, %v2231_v25  ;;  %v1239_v4 = vadd.f32 %v2265_v6, %v1200_v2  ;;  %v438_v22 = vmul.f32 %v1546_v12, %v2307_v28 }
  0xa6   : > { %v1082_v23 = vadd.f32 %v1034_v47, %v982_v55  ;;  %v517_v31 = vmul.f32 %v1548_v13, %v2199_v52  ;;  %v1083_v14 = vadd.f32 %v1035_v63, %v983_v62  ;;  %v569_v20 = vmul.f32 %v1556_v17, %v2275_v48 }
  0xa7   : > { %v810_v8 = vsel %vm783_vm0, %v743_v60, %v759_v56  ;;  %v402_v3 = vadd.f32 %v370_v15, %v334_v0  ;;  %1272 = vst.msk [vmem:[%s1659_s29 + $0x98] sm:$0xff] %vm1252_vm2, %v1239_v4  ;;  %v669_v9 = vmul.f32 %v1558_v18, %v2346_v5  ;;  %v884_v27 = vmul.f32 %v1560_v19, %v2199_v52 }
  0xa8   : > { %v836_v24 = vadd.f32 %v810_v8, %v469_v57  ;;  %v1110_v38 = vrot.slane %v1082_v23, 2  ;;  %v1126_v29 = vrot.slane %v1083_v14, 2  ;;  %v617_v33 = vadd.f32 %v569_v20, %v517_v31 }
  0xa9   : > { %v470_v45 = vadd.f32 %v438_v22, %v402_v3  ;;  %v936_v7 = vmul.f32 %v1594_v39, %v2275_v48  ;;  %v1036_v36 = vmul.f32 %v2181_v26, %v2346_v5  ;;  %v335_v42 = vmul.f32 %v1542_v10, %v2212_v21 }
  0xaa   : > { %v371_v37 = vmul.f32 %v1544_v11, %v2288_v61  ;;  %v439_v52 = vmul.f32 %v1546_v12, %v2359_v35  ;;  %v1175_v40 = vsel %vm1148_vm1, %v1110_v38, %v1126_v29  ;;  %v717_v30 = vadd.f32 %v669_v9, %v617_v33 }
  0xab   : > { %v984_v43 = vadd.f32 %v936_v7, %v884_v27  ;;  %v518_v57 = vmul.f32 %v1548_v13, %v2212_v21  ;;  %v1201_v46 = vadd.f32 %v1175_v40, %v836_v24  ;;  %v519_v34 = vmul.f32 %v1548_v13, %v2231_v25 }
  0xac   : > { %v403_v32 = vadd.f32 %v371_v37, %v335_v42  ;;  %v570_v49 = vmul.f32 %v1556_v17, %v2288_v61  ;;  %v775_v50 = vrot.slane %v717_v30, 1  ;;  %v571_v44 = vmul.f32 %v1556_v17, %v2307_v28 }
  0xad   : > { %v1084_v51 = vadd.f32 %v1036_v36, %v984_v43  ;;  %v670_v53 = vmul.f32 %v1558_v18, %v2359_v35  ;;  %v1240_v54 = vadd.f32 %v2265_v6, %v1201_v46  ;;  %v671_v41 = vmul.f32 %v1558_v18, %v2378_v58  ;;  %v2417_v36 = vld [vmem:[%s1540_s21 + $0x148] sm:$0xff] }
  0xae   : > { %v471_v59 = vadd.f32 %v439_v52, %v403_v32  ;;  %v618_v16 = vadd.f32 %v570_v49, %v518_v57  ;;  %v794_v47 = vsel %vm783_vm0, %v759_v56, %v775_v50  ;;  %v619_v60 = vadd.f32 %v571_v44, %v519_v34  ;;  %v2430_v34 = vld [vmem:[%s1540_s21 + $0x150] sm:$0xff] }
  0xaf   : > { %v1142_v2 = vrot.slane %v1084_v51, 2  ;;  %v885_v55 = vmul.f32 %v1560_v19, %v2212_v21  ;;  %1273 = vst.msk [vmem:[%s1659_s29 + $0xa0] sm:$0xff] %vm1252_vm2, %v1240_v54  ;;  %v837_v63 = vadd.f32 %v794_v47, %v470_v45  ;;  %v886_v0 = vmul.f32 %v1560_v19, %v2231_v25 }
  0xb0   : > { %v718_v62 = vadd.f32 %v670_v53, %v618_v16  ;;  %v937_v15 = vmul.f32 %v1594_v39, %v2288_v61  ;;  %v719_v23 = vadd.f32 %v671_v41, %v619_v60  ;;  %v938_v56 = vmul.f32 %v1594_v39, %v2307_v28 }
  0xb1   : > { %v1159_v4 = vsel %vm1148_vm1, %v1126_v29, %v1142_v2  ;;  %v1037_v21 = vmul.f32 %v2181_v26, %v2359_v35  ;;  %v1038_v14 = vmul.f32 %v2181_v26, %v2378_v58  ;;  %v336_v24 = vmul.f32 %v1542_v10, %v2231_v25 }
  0xb2   : > { %v1202_v22 = vadd.f32 %v1159_v4, %v837_v63  ;;  %v744_v31 = vrot.slane %v718_v62, 1  ;;  %v985_v8 = vadd.f32 %v937_v15, %v885_v55  ;;  %v760_v3 = vrot.slane %v719_v23, 1  ;;  %v2449_v63 = vld [vmem:[%s1540_s21 + $0x158] sm:$0xff] }
  0xb3   : > { %v986_v20 = vadd.f32 %v938_v56, %v886_v0  ;;  %v372_v38 = vmul.f32 %v1544_v11, %v2307_v28  ;;  %v440_v29 = vmul.f32 %v1546_v12, %v2378_v58  ;;  %v520_v45 = vmul.f32 %v1548_v13, %v2275_v48 }
  0xb4   : > { %v1241_v9 = vadd.f32 %v2265_v6, %v1202_v22  ;;  %v1085_v27 = vadd.f32 %v1037_v21, %v985_v8  ;;  %v811_v33 = vsel %vm783_vm0, %v744_v31, %v760_v3  ;;  %v572_v42 = vmul.f32 %v1556_v17, %v2346_v5 }
  0xb5   : > { %v1086_v7 = vadd.f32 %v1038_v14, %v986_v20  ;;  %v404_v25 = vadd.f32 %v372_v38, %v336_v24  ;;  %v838_v37 = vadd.f32 %v811_v33, %v471_v59  ;;  %v672_v40 = vmul.f32 %v1558_v18, %v2417_v36 }
  0xb6   : > { %1274 = vst.msk [vmem:[%s1659_s29 + $0xa8] sm:$0xff] %vm1252_vm2, %v1241_v9  ;;  %v1111_v52 = vrot.slane %v1085_v27, 2  ;;  %v887_v30 = vmul.f32 %v1560_v19, %v2275_v48  ;;  %v620_v46 = vadd.f32 %v572_v42, %v520_v45  ;;  %v939_v32 = vmul.f32 %v1594_v39, %v2346_v5 }
  0xb7   : > { %v1127_v43 = vrot.slane %v1086_v7, 2  ;;  %v472_v57 = vadd.f32 %v440_v29, %v404_v25  ;;  %v1039_v49 = vmul.f32 %v2181_v26, %v2417_v36  ;;  %v337_v50 = vmul.f32 %v1542_v10, %v2288_v61 }
  0xb8   : > { %v373_v51 = vmul.f32 %v1544_v11, %v2359_v35  ;;  %v441_v48 = vmul.f32 %v1546_v12, %v2430_v34  ;;  %v720_v53 = vadd.f32 %v672_v40, %v620_v46  ;;  %v987_v54 = vadd.f32 %v939_v32, %v887_v30 }
  0xb9   : > { %v1176_v44 = vsel %vm1148_vm1, %v1111_v52, %v1127_v43  ;;  %v521_v59 = vmul.f32 %v1548_v13, %v2288_v61  ;;  %v522_v47 = vmul.f32 %v1548_v13, %v2307_v28  ;;  %v573_v2 = vmul.f32 %v1556_v17, %v2359_v35 }
  0xba   : > { %v1203_v16 = vadd.f32 %v1176_v44, %v838_v37  ;;  %v405_v41 = vadd.f32 %v373_v51, %v337_v50  ;;  %v776_v60 = vrot.slane %v720_v53, 1  ;;  %v1087_v55 = vadd.f32 %v1039_v49, %v987_v54  ;;  %v2488_v49 = vld [vmem:[%s1540_s21 + $0x160] sm:$0xff] }
  0xbb   : > { %v574_v62 = vmul.f32 %v1556_v17, %v2378_v58  ;;  %v673_v0 = vmul.f32 %v1558_v18, %v2430_v34  ;;  %v621_v23 = vadd.f32 %v573_v2, %v521_v59  ;;  %v674_v56 = vmul.f32 %v1558_v18, %v2449_v63 }
  0xbc   : > { %v1242_v15 = vadd.f32 %v2265_v6, %v1203_v16  ;;  %v473_v4 = vadd.f32 %v441_v48, %v405_v41  ;;  %v795_v21 = vsel %vm783_vm0, %v760_v3, %v776_v60  ;;  %v1143_v22 = vrot.slane %v1087_v55, 2 }
  0xbd   : > { %v622_v31 = vadd.f32 %v574_v62, %v522_v47  ;;  %v888_v8 = vmul.f32 %v1560_v19, %v2288_v61  ;;  %v839_v14 = vadd.f32 %v795_v21, %v472_v57  ;;  %v721_v20 = vadd.f32 %v673_v0, %v621_v23  ;;  %v2501_v47 = vld [vmem:[%s1540_s21 + $0x168] sm:$0xff] }
  0xbe   : > { %1275 = vst.msk [vmem:[%s1659_s29 + $0xb0] sm:$0xff] %vm1252_vm2, %v1242_v15  ;;  %v889_v24 = vmul.f32 %v1560_v19, %v2307_v28  ;;  %v940_v38 = vmul.f32 %v1594_v39, %v2359_v35  ;;  %v1160_v9 = vsel %vm1148_vm1, %v1127_v43, %v1143_v22  ;;  %v941_v3 = vmul.f32 %v1594_v39, %v2378_v58 }
  0xbf   : > { %v722_v27 = vadd.f32 %v674_v56, %v622_v31  ;;  %v1040_v61 = vmul.f32 %v2181_v26, %v2430_v34  ;;  %v1204_v29 = vadd.f32 %v1160_v9, %v839_v14  ;;  %v745_v45 = vrot.slane %v721_v20, 1  ;;  %v2520_v14 = vld [vmem:[%s1540_s21 + $0x170] sm:$0xff] }
  0xc0   : > { %v988_v33 = vadd.f32 %v940_v38, %v888_v8  ;;  %v1041_v7 = vmul.f32 %v2181_v26, %v2449_v63  ;;  %v989_v42 = vadd.f32 %v941_v3, %v889_v24  ;;  %v338_v37 = vmul.f32 %v1542_v10, %v2307_v28 }
  0xc1   : > { %v761_v25 = vrot.slane %v722_v27, 1  ;;  %v374_v52 = vmul.f32 %v1544_v11, %v2378_v58  ;;  %v1243_v40 = vadd.f32 %v2265_v6, %v1204_v29  ;;  %v442_v43 = vmul.f32 %v1546_v12, %v2449_v63 }
  0xc2   : > { %v1088_v30 = vadd.f32 %v1040_v61, %v988_v33  ;;  %v523_v57 = vmul.f32 %v1548_v13, %v2346_v5  ;;  %v1089_v32 = vadd.f32 %v1041_v7, %v989_v42  ;;  %v575_v50 = vmul.f32 %v1556_v17, %v2417_v36 }
  0xc3   : > { %v812_v46 = vsel %vm783_vm0, %v745_v45, %v761_v25  ;;  %v406_v28 = vadd.f32 %v374_v52, %v338_v37  ;;  %1276 = vst.msk [vmem:[%s1659_s29 + $0xb8] sm:$0xff] %vm1252_vm2, %v1243_v40  ;;  %v675_v44 = vmul.f32 %v1558_v18, %v2488_v49  ;;  %v890_v53 = vmul.f32 %v1560_v19, %v2346_v5 }
  0xc4   : > { %v840_v51 = vadd.f32 %v812_v46, %v473_v4  ;;  %v1112_v48 = vrot.slane %v1088_v30, 2  ;;  %v1128_v54 = vrot.slane %v1089_v32, 2  ;;  %v623_v16 = vadd.f32 %v575_v50, %v523_v57 }
  0xc5   : > { %v474_v59 = vadd.f32 %v442_v43, %v406_v28  ;;  %v942_v41 = vmul.f32 %v1594_v39, %v2417_v36  ;;  %v1042_v2 = vmul.f32 %v2181_v26, %v2488_v49  ;;  %v339_v60 = vmul.f32 %v1542_v10, %v2359_v35 }
  0xc6   : > { %v375_v55 = vmul.f32 %v1544_v11, %v2430_v34  ;;  %v443_v5 = vmul.f32 %v1546_v12, %v2501_v47  ;;  %v1177_v62 = vsel %vm1148_vm1, %v1112_v48, %v1128_v54  ;;  %v723_v0 = vadd.f32 %v675_v44, %v623_v16 }
  0xc7   : > { %v990_v15 = vadd.f32 %v942_v41, %v890_v53  ;;  %v524_v4 = vmul.f32 %v1548_v13, %v2359_v35  ;;  %v1205_v23 = vadd.f32 %v1177_v62, %v840_v51  ;;  %v525_v21 = vmul.f32 %v1548_v13, %v2378_v58 }
  0xc8   : > { %v407_v56 = vadd.f32 %v375_v55, %v339_v60  ;;  %v576_v22 = vmul.f32 %v1556_v17, %v2430_v34  ;;  %v777_v31 = vrot.slane %v723_v0, 1  ;;  %v577_v20 = vmul.f32 %v1556_v17, %v2449_v63 }
  0xc9   : > { %v1090_v8 = vadd.f32 %v1042_v2, %v990_v15  ;;  %v676_v24 = vmul.f32 %v1558_v18, %v2501_v47  ;;  %v1244_v38 = vadd.f32 %v2265_v6, %v1205_v23  ;;  %v677_v3 = vmul.f32 %v1558_v18, %v2520_v14  ;;  %v2559_v2 = vld [vmem:[%s1540_s21 + $0x178] sm:$0xff] }
  0xca   : > { %v475_v9 = vadd.f32 %v443_v5, %v407_v56  ;;  %v624_v27 = vadd.f32 %v576_v22, %v524_v4  ;;  %v796_v61 = vsel %vm783_vm0, %v761_v25, %v777_v31  ;;  %v625_v45 = vadd.f32 %v577_v20, %v525_v21  ;;  %v2572_v21 = vld [vmem:[%s1540_s21 + $0x180] sm:$0xff] }
  0xcb   : > { %v1144_v29 = vrot.slane %v1090_v8, 2  ;;  %v891_v33 = vmul.f32 %v1560_v19, %v2359_v35  ;;  %1277 = vst.msk [vmem:[%s1659_s29 + $0xc0] sm:$0xff] %vm1252_vm2, %v1244_v38  ;;  %v841_v7 = vadd.f32 %v796_v61, %v474_v59  ;;  %v892_v37 = vmul.f32 %v1560_v19, %v2378_v58 }
  0xcc   : > { %v724_v42 = vadd.f32 %v676_v24, %v624_v27  ;;  %v943_v52 = vmul.f32 %v1594_v39, %v2430_v34  ;;  %v725_v30 = vadd.f32 %v677_v3, %v625_v45  ;;  %v944_v25 = vmul.f32 %v1594_v39, %v2449_v63 }
  0xcd   : > { %v1161_v40 = vsel %vm1148_vm1, %v1128_v54, %v1144_v29  ;;  %v1043_v35 = vmul.f32 %v2181_v26, %v2501_v47  ;;  %v1044_v32 = vmul.f32 %v2181_v26, %v2520_v14  ;;  %v340_v51 = vmul.f32 %v1542_v10, %v2378_v58 }
  0xce   : > { %v1206_v43 = vadd.f32 %v1161_v40, %v841_v7  ;;  %v746_v57 = vrot.slane %v724_v42, 1  ;;  %v991_v46 = vadd.f32 %v943_v52, %v891_v33  ;;  %v762_v28 = vrot.slane %v725_v30, 1  ;;  %v2591_v7 = vld [vmem:[%s1540_s21 + $0x188] sm:$0xff] }
  0xcf   : > { %v992_v50 = vadd.f32 %v944_v25, %v892_v37  ;;  %v376_v48 = vmul.f32 %v1544_v11, %v2449_v63  ;;  %v444_v54 = vmul.f32 %v1546_v12, %v2520_v14  ;;  %v526_v59 = vmul.f32 %v1548_v13, %v2417_v36 }
  0xd0   : > { %v1245_v44 = vadd.f32 %v2265_v6, %v1206_v43  ;;  %v1091_v53 = vadd.f32 %v1043_v35, %v991_v46  ;;  %v813_v16 = vsel %vm783_vm0, %v746_v57, %v762_v28  ;;  %v578_v60 = vmul.f32 %v1556_v17, %v2488_v49 }
  0xd1   : > { %v1092_v41 = vadd.f32 %v1044_v32, %v992_v50  ;;  %v408_v58 = vadd.f32 %v376_v48, %v340_v51  ;;  %v842_v55 = vadd.f32 %v813_v16, %v475_v9  ;;  %v678_v62 = vmul.f32 %v1558_v18, %v2559_v2 }
  0xd2   : > { %1278 = vst.msk [vmem:[%s1659_s29 + $0xc8] sm:$0xff] %vm1252_vm2, %v1245_v44  ;;  %v1113_v5 = vrot.slane %v1091_v53, 2  ;;  %v893_v0 = vmul.f32 %v1560_v19, %v2417_v36  ;;  %v626_v23 = vadd.f32 %v578_v60, %v526_v59  ;;  %v945_v56 = vmul.f32 %v1594_v39, %v2488_v49 }
  0xd3   : > { %v1129_v15 = vrot.slane %v1092_v41, 2  ;;  %v476_v4 = vadd.f32 %v444_v54, %v408_v58  ;;  %v1045_v22 = vmul.f32 %v2181_v26, %v2559_v2  ;;  %v341_v31 = vmul.f32 %v1542_v10, %v2430_v34 }
  0xd4   : > { %v377_v8 = vmul.f32 %v1544_v11, %v2501_v47  ;;  %v445_v36 = vmul.f32 %v1546_v12, %v2572_v21  ;;  %v726_v24 = vadd.f32 %v678_v62, %v626_v23  ;;  %v993_v38 = vadd.f32 %v945_v56, %v893_v0 }
  0xd5   : > { %v1178_v20 = vsel %vm1148_vm1, %v1113_v5, %v1129_v15  ;;  %v527_v9 = vmul.f32 %v1548_v13, %v2430_v34  ;;  %v528_v61 = vmul.f32 %v1548_v13, %v2449_v63  ;;  %v579_v29 = vmul.f32 %v1556_v17, %v2501_v47 }
  0xd6   : > { %v1207_v27 = vadd.f32 %v1178_v20, %v842_v55  ;;  %v409_v3 = vadd.f32 %v377_v8, %v341_v31  ;;  %v778_v45 = vrot.slane %v726_v24, 1  ;;  %v1093_v33 = vadd.f32 %v1045_v22, %v993_v38  ;;  %v2630_v22 = vld [vmem:[%s1540_s21 + $0x190] sm:$0xff] }
  0xd7   : > { %v580_v42 = vmul.f32 %v1556_v17, %v2520_v14  ;;  %v679_v37 = vmul.f32 %v1558_v18, %v2572_v21  ;;  %v627_v30 = vadd.f32 %v579_v29, %v527_v9  ;;  %v680_v25 = vmul.f32 %v1558_v18, %v2591_v7 }
  0xd8   : > { %v1246_v52 = vadd.f32 %v2265_v6, %v1207_v27  ;;  %v477_v40 = vadd.f32 %v445_v36, %v409_v3  ;;  %v797_v35 = vsel %vm783_vm0, %v762_v28, %v778_v45  ;;  %v1145_v43 = vrot.slane %v1093_v33, 2 }
  0xd9   : > { %v628_v57 = vadd.f32 %v580_v42, %v528_v61  ;;  %v894_v46 = vmul.f32 %v1560_v19, %v2430_v34  ;;  %v843_v32 = vadd.f32 %v797_v35, %v476_v4  ;;  %v727_v50 = vadd.f32 %v679_v37, %v627_v30  ;;  %v306_v61 = vld [vmem:[%s1540_s21 + $0x198] sm:$0xff] }
  0xda   : > { %1279 = vst.msk [vmem:[%s1659_s29 + $0xd0] sm:$0xff] %vm1252_vm2, %v1246_v52  ;;  %v895_v51 = vmul.f32 %v1560_v19, %v2449_v63  ;;  %v946_v48 = vmul.f32 %v1594_v39, %v2501_v47  ;;  %v1162_v44 = vsel %vm1148_vm1, %v1129_v15, %v1145_v43  ;;  %v947_v28 = vmul.f32 %v1594_v39, %v2520_v14 }
  0xdb   : > { %v728_v53 = vadd.f32 %v680_v25, %v628_v57  ;;  %v1046_v34 = vmul.f32 %v2181_v26, %v2572_v21  ;;  %v1208_v54 = vadd.f32 %v1162_v44, %v843_v32  ;;  %v747_v59 = vrot.slane %v727_v50, 1 }
  0xdc   : > { %v994_v16 = vadd.f32 %v946_v48, %v894_v46  ;;  %v1047_v41 = vmul.f32 %v2181_v26, %v2591_v7  ;;  %v995_v60 = vadd.f32 %v947_v28, %v895_v51  ;;  %v342_v55 = vmul.f32 %v1542_v10, %v2449_v63 }
  0xdd   : > { %v763_v58 = vrot.slane %v728_v53, 1  ;;  %v378_v5 = vmul.f32 %v1544_v11, %v2520_v14  ;;  %v1247_v62 = vadd.f32 %v2265_v6, %v1208_v54  ;;  %v446_v15 = vmul.f32 %v1546_v12, %v2591_v7 }
  0xde   : > { %v1094_v0 = vadd.f32 %v1046_v34, %v994_v16  ;;  %v529_v4 = vmul.f32 %v1548_v13, %v2488_v49  ;;  %v1095_v56 = vadd.f32 %v1047_v41, %v995_v60  ;;  %v581_v31 = vmul.f32 %v1556_v17, %v2559_v2 }
  0xdf   : > { %v814_v23 = vsel %vm783_vm0, %v747_v59, %v763_v58  ;;  %v410_v63 = vadd.f32 %v378_v5, %v342_v55  ;;  %1280 = vst.msk [vmem:[%s1659_s29 + $0xd8] sm:$0xff] %vm1252_vm2, %v1247_v62  ;;  %v681_v20 = vmul.f32 %v1558_v18, %v2630_v22  ;;  %v896_v24 = vmul.f32 %v1560_v19, %v2488_v49 }
  0xe0   : > { %v844_v8 = vadd.f32 %v814_v23, %v477_v40  ;;  %v1114_v36 = vrot.slane %v1094_v0, 2  ;;  %v1130_v38 = vrot.slane %v1095_v56, 2  ;;  %v629_v27 = vadd.f32 %v581_v31, %v529_v4  ;;  %v307_v40 = vld [vmem:[%s1540_s21 + $0x1a0] sm:$0xff] }
  0xe1   : > { %v478_v9 = vadd.f32 %v446_v15, %v410_v63  ;;  %v948_v3 = vmul.f32 %v1594_v39, %v2559_v2  ;;  %v1048_v29 = vmul.f32 %v2181_v26, %v2630_v22  ;;  %v343_v45 = vmul.f32 %v1542_v10, %v2501_v47 }
  0xe2   : > { %v379_v33 = vmul.f32 %v1544_v11, %v2572_v21  ;;  %v447_v42 = vmul.f32 %v1546_v12, %v306_v61  ;;  %v1179_v49 = vsel %vm1148_vm1, %v1114_v36, %v1130_v38  ;;  %v729_v37 = vadd.f32 %v681_v20, %v629_v27 }
  0xe3   : > { %v996_v52 = vadd.f32 %v948_v3, %v896_v24  ;;  %v530_v30 = vmul.f32 %v1548_v13, %v2501_v47  ;;  %v1209_v25 = vadd.f32 %v1179_v49, %v844_v8  ;;  %v531_v43 = vmul.f32 %v1548_v13, %v2520_v14  ;;  %v308_v8 = vld [vmem:[%s1540_s21 + $0x1a8] sm:$0xff] }
  0xe4   : > { %v411_v35 = vadd.f32 %v379_v33, %v343_v45  ;;  %v582_v57 = vmul.f32 %v1556_v17, %v2572_v21  ;;  %v779_v46 = vrot.slane %v729_v37, 1  ;;  %v583_v50 = vmul.f32 %v1556_v17, %v2591_v7 }
  0xe5   : > { %v1096_v32 = vadd.f32 %v1048_v29, %v996_v52  ;;  %v682_v51 = vmul.f32 %v1558_v18, %v306_v61  ;;  %v1248_v48 = vadd.f32 %v2265_v6, %v1209_v25  ;;  %v683_v28 = vmul.f32 %v1558_v18, %v307_v40 }
  0xe6   : > { %v479_v44 = vadd.f32 %v447_v42, %v411_v35  ;;  %v630_v53 = vadd.f32 %v582_v57, %v530_v30  ;;  %v798_v34 = vsel %vm783_vm0, %v763_v58, %v779_v46  ;;  %v631_v59 = vadd.f32 %v583_v50, %v531_v43 }
  0xe7   : > { %v1146_v54 = vrot.slane %v1096_v32, 2  ;;  %v897_v16 = vmul.f32 %v1560_v19, %v2501_v47  ;;  %1281 = vst.msk [vmem:[%s1659_s29 + $0xe0] sm:$0xff] %vm1252_vm2, %v1248_v48  ;;  %v845_v41 = vadd.f32 %v798_v34, %v478_v9  ;;  %v898_v55 = vmul.f32 %v1560_v19, %v2520_v14 }
  0xe8   : > { %v730_v60 = vadd.f32 %v682_v51, %v630_v53  ;;  %v949_v5 = vmul.f32 %v1594_v39, %v2572_v21  ;;  %v731_v58 = vadd.f32 %v683_v28, %v631_v59  ;;  %v950_v0 = vmul.f32 %v1594_v39, %v2591_v7 }
  0xe9   : > { %v1163_v62 = vsel %vm1148_vm1, %v1130_v38, %v1146_v54  ;;  %v1049_v47 = vmul.f32 %v2181_v26, %v306_v61  ;;  %v1050_v56 = vmul.f32 %v2181_v26, %v307_v40  ;;  %v344_v21 = vmul.f32 %v1542_v10, %v2520_v14 }
  0xea   : > { %v1210_v15 = vadd.f32 %v1163_v62, %v845_v41  ;;  %v748_v4 = vrot.slane %v730_v60, 1  ;;  %v997_v23 = vadd.f32 %v949_v5, %v897_v16  ;;  %v764_v63 = vrot.slane %v731_v58, 1 }
  0xeb   : > { %v998_v31 = vadd.f32 %v950_v0, %v898_v55  ;;  %v380_v36 = vmul.f32 %v1544_v11, %v2591_v7  ;;  %v448_v38 = vmul.f32 %v1546_v12, %v307_v40  ;;  %v532_v9 = vmul.f32 %v1548_v13, %v2559_v2 }
  0xec   : > { %v1249_v20 = vadd.f32 %v2265_v6, %v1210_v15  ;;  %v1097_v24 = vadd.f32 %v1049_v47, %v997_v23  ;;  %v815_v27 = vsel %vm783_vm0, %v748_v4, %v764_v63  ;;  %v584_v29 = vmul.f32 %v1556_v17, %v2630_v22 }
  0xed   : > { %v1098_v3 = vadd.f32 %v1050_v56, %v998_v31  ;;  %v412_v61 = vadd.f32 %v380_v36, %v344_v21  ;;  %v846_v10 = vadd.f32 %v815_v27, %v479_v44  ;;  %v684_v14 = vmul.f32 %v1558_v18, %v308_v8 }
  0xee   : > { %1282 = vst.msk [vmem:[%s1659_s29 + $0xe8] sm:$0xff] %vm1252_vm2, %v1249_v20  ;;  %v1115_v11 = vrot.slane %v1097_v24, 2  ;;  %v899_v12 = vmul.f32 %v1560_v19, %v2559_v2  ;;  %v632_v13 = vadd.f32 %v584_v29, %v532_v9  ;;  %v951_v45 = vmul.f32 %v1594_v39, %v2630_v22 }
  0xef   : > { %v1131_v7 = vrot.slane %v1098_v3, 2  ;;  %v1051_v33 = vmul.f32 %v2181_v26, %v308_v8  ;;  %v480_v52 = vadd.f32 %v448_v38, %v412_v61 }
  0xf0   : > { %v732_v42 = vadd.f32 %v684_v14, %v632_v13  ;;  %v999_v49 = vadd.f32 %v951_v45, %v899_v12 }
  0xf1   : > { %v1180_v17 = vsel %vm1148_vm1, %v1115_v11, %v1131_v7 }
  0xf2   : > { %v1211_v37 = vadd.f32 %v1180_v17, %v846_v10  ;;  %v780_v18 = vrot.slane %v732_v42, 1  ;;  %v1099_v40 = vadd.f32 %v1051_v33, %v999_v49 }
  0xf4   : > { %v1250_v30 = vadd.f32 %v2265_v6, %v1211_v37  ;;  %v799_v19 = vsel %vm783_vm0, %v764_v63, %v780_v18  ;;  %v1147_v2 = vrot.slane %v1099_v40, 2 }
  0xf5   : > { %v847_v39 = vadd.f32 %v799_v19, %v480_v52 }
  0xf6   : > { %1283 = vst.msk [vmem:[%s1659_s29 + $0xf0] sm:$0xff] %vm1252_vm2, %v1250_v30  ;;  %v1164_v26 = vsel %vm1148_vm1, %v1131_v7, %v1147_v2 }
  0xf7   : > { %v1212_v22 = vadd.f32 %v1164_v26, %v847_v39 }
  0xf9   : > { %v1251_v25 = vadd.f32 %v2265_v6, %v1212_v22 }
  0xfb   : > { %1284 = vst.msk [vmem:[%s1659_s29 + $0xf8] sm:$0xff] %vm1252_vm2, %v1251_v25 }
  0xfc PF: > { %s13_s14 = sadd.s32 1, %s1482_s14   ;;  %s2726_s12 = smov %s1478_s13 }
  0xfd   : > { %p10_p5 = scmp.ge.s32.totalorder %s13_s14, 4   ;;  %s2727_s13 = smov %s2729_s15 }
  0xff   :  { %12 = sbr.rel (!%p10_p5) target bundleno = 2 (0x2), region = 68 }

</bundles_post_ra>
